<compile_context>
chip_gen: v5e
topology: v5e:2x2
jax: 0.10.0
libtpu: 0.0.40
codegen_flags: <defaults>
</compile_context>

<pallas_src>
import jax
import jax.numpy as jnp
from jax import lax
from jax.experimental import pallas as pl
from jax.experimental.pallas import tpu as pltpu

KSIZE = 7
PAD = (KSIZE - 1) // 2
BN_EPS = 1e-5


def _make_cbam_kernel(H, W):
    HW = H * W
    inv_hw = 1.0 / float(HW)

    def kernel(x_ref, w1_ref, b1_ref, w2_ref, b2_ref, col_ref, row_ref,
               wconv_ref, bn_ref, out_ref):
        # x block: (1, C, H*W) -> (C, H*W), lane-dense.
        # TODO(synk): for bf16 inputs on v6e/v7x the two big elementwise
        # multiplies could stay in bf16; kept in f32 here (also correct on v5e).
        x = x_ref[0].astype(jnp.float32)
        C = x.shape[0]

        # ---------------- Channel attention ----------------
        # Global avg pool as an MXU matmul (frees the XLU for the max pool).
        sum_pool = jnp.dot(x, jnp.ones((HW, 1), jnp.float32),
                           preferred_element_type=jnp.float32)        # (C, 1)
        avg_pool = sum_pool * inv_hw
        max_pool = jnp.max(x, axis=1, keepdims=True)                   # (C, 1)

        # Stack (avg | max) into a (C, 2) RHS and run the shared MLP once.
        col2 = lax.broadcasted_iota(jnp.int32, (C, 2), 1)
        p = jnp.where(col2 == 0, avg_pool, max_pool)                   # (C, 2)

        w1 = w1_ref[...]   # (hid, C)
        b1 = b1_ref[...]   # (hid, 1)
        w2 = w2_ref[...]   # (C, hid)
        b2 = b2_ref[...]   # (C, 1)
        h = jnp.maximum(jnp.dot(w1, p, preferred_element_type=jnp.float32) + b1, 0.0)
        l = jnp.dot(w2, h, preferred_element_type=jnp.float32) + b2    # (C, 2)
        logits = jnp.sum(l, axis=1, keepdims=True)                     # (C, 1)

        # Sigmoid kept exact (pl.reciprocal(approx=True) would shave a few
        # VALU cycles on these tiny arrays at ~1e-3 output error).
        ch_scale = 1.0 / (1.0 + jnp.exp(-logits))                      # (C, 1)
        x_ca = x * ch_scale                                            # (C, H*W)

        # ---------------- Spatial attention ----------------
        # ChannelPool on the flat layout: max on the XLU, mean on the MXU.
        c_max = jnp.max(x_ca, axis=0, keepdims=True)                   # (1, H*W)
        c_mean = jnp.dot(jnp.full((1, C), 1.0 / C, jnp.float32), x_ca,
                         preferred_element_type=jnp.float32)           # (1, H*W)

        col = col_ref[...]   # (1, H*W) int32: flat-index -> column (p % W)
        row = row_ref[...]   # (1, H*W) int32: flat-index -> row    (p // W)

        # 14 horizontal taps (7 lane shifts x 2 pooled maps); zero padding is
        # handled by column-validity masks shared between the two channels.
        pools = (c_max, c_mean)
        htaps = [[None] * KSIZE for _ in range(2)]
        for dj in range(KSIZE):
            dc = dj - PAD
            if dc != 0:
                cc = col + dc
                cmask = (cc >= 0) & (cc < W)
            for ci in range(2):
                t = pools[ci]
                if dc != 0:
                    t = pltpu.roll(t, shift=(-dc) % HW, axis=1)
                    t = jnp.where(cmask, t, 0.0)
                htaps[ci][dj] = t

        # For each of the 7 kernel rows: weighted sum of the 14 horizontal taps
        # (two independent partial sums), then one row-shift roll + row mask.
        acc0 = jnp.zeros((1, HW), jnp.float32)
        acc1 = jnp.zeros((1, HW), jnp.float32)
        for di in range(KSIZE):
            dr = di - PAD
            r0 = jnp.zeros((1, HW), jnp.float32)
            r1 = jnp.zeros((1, HW), jnp.float32)
            for ci in range(2):
                for dj in range(KSIZE):
                    wv = wconv_ref[ci * KSIZE * KSIZE + di * KSIZE + dj]  # SMEM scalar
                    term = wv * htaps[ci][dj]
                    if dj % 2 == 0:
                        r0 = r0 + term
                    else:
                        r1 = r1 + term
            r = r0 + r1
            if dr != 0:
                r = pltpu.roll(r, shift=(-dr * W) % HW, axis=1)
                rr = row + dr
                r = jnp.where((rr >= 0) & (rr < H), r, 0.0)
            if di % 2 == 0:
                acc0 = acc0 + r
            else:
                acc1 = acc1 + r
        conv = acc0 + acc1                                             # (1, H*W)

        # BatchNorm2d(num_features=1), eval mode (running stats + affine).
        # TODO(synk): train-mode BN (batch statistics + running-stat update) is
        # a cross-batch side-effecting op and is not reproduced here.
        gamma, beta, r_mean, r_var = bn_ref[0], bn_ref[1], bn_ref[2], bn_ref[3]
        bn = (conv - r_mean) * (gamma / jnp.sqrt(r_var + BN_EPS)) + beta

        sp_scale = 1.0 / (1.0 + jnp.exp(-bn))                          # (1, H*W)
        out_ref[0] = (x_ca * sp_scale).astype(out_ref.dtype)

    return kernel


def cbam_forward(x, params):
    w1, b1, w2, b2, wconv, bn = params
    B, C, H, W = x.shape
    hid = w1.shape[0]
    HW = H * W

    x_flat = x.reshape(B, C, HW)                           # lane-dense layout
    wconv_flat = wconv.reshape(-1).astype(jnp.float32)     # (2*7*7,) [c, kh, kw]
    b1c = b1.reshape(hid, 1).astype(jnp.float32)
    b2c = b2.reshape(C, 1).astype(jnp.float32)

    lane = jnp.arange(HW, dtype=jnp.int32)
    colmap = (lane % W).reshape(1, HW)                     # flat -> column
    rowmap = (lane // W).reshape(1, HW)                    # flat -> row

    # TODO(synk): for production shapes (C~512, H=W=56) add a channel-tile grid
    # axis (running max/mean pool accumulators + pl.when finalize) to stay
    # inside v7x's 64 MiB VMEM; unnecessary at these sizes.
    kernel = pl.pallas_call(
        _make_cbam_kernel(H, W),
        out_shape=jax.ShapeDtypeStruct((B, C, HW), x.dtype),
        grid_spec=pltpu.PrefetchScalarGridSpec(
            num_scalar_prefetch=0,
            grid=(B,),
            in_specs=[
                pl.BlockSpec((1, C, HW), lambda b: (b, 0, 0)),         # x
                pl.BlockSpec((hid, C), lambda b: (0, 0)),              # W1
                pl.BlockSpec((hid, 1), lambda b: (0, 0)),              # b1
                pl.BlockSpec((C, hid), lambda b: (0, 0)),              # W2
                pl.BlockSpec((C, 1), lambda b: (0, 0)),                # b2
                pl.BlockSpec((1, HW), lambda b: (0, 0)),               # col idx
                pl.BlockSpec((1, HW), lambda b: (0, 0)),               # row idx
                pl.BlockSpec(memory_space=pltpu.MemorySpace.SMEM),     # conv w
                pl.BlockSpec(memory_space=pltpu.MemorySpace.SMEM),     # bn params
            ],
            out_specs=pl.BlockSpec((1, C, HW), lambda b: (b, 0, 0)),
        ),
        compiler_params=pltpu.CompilerParams(
            dimension_semantics=("parallel",)),
    )
    out_flat = kernel(x_flat, w1.astype(jnp.float32), b1c,
                      w2.astype(jnp.float32), b2c, colmap, rowmap,
                      wconv_flat, bn.astype(jnp.float32))
    return out_flat.reshape(B, C, H, W)


def cbam_reference(x, params):
    """Plain-JAX reference mirroring the PyTorch forward (BN in eval mode)."""
    w1, b1, w2, b2, wconv, bn = params
    gamma, beta, r_mean, r_var = bn[0], bn[1], bn[2], bn[3]

    avg = jnp.mean(x, axis=(2, 3))
    mx = jnp.max(x, axis=(2, 3))

    def mlp(v):
        h = jnp.maximum(v @ w1.T + b1, 0.0)
        return h @ w2.T + b2

    att = jax.nn.sigmoid(mlp(avg) + mlp(mx))
    x_ca = x * att[:, :, None, None]

    xc = jnp.concatenate([x_ca.max(axis=1, keepdims=True),
                          x_ca.mean(axis=1, keepdims=True)], axis=1)
    conv = lax.conv_general_dilated(
        xc, wconv, window_strides=(1, 1),
        padding=[(PAD, PAD), (PAD, PAD)],
        dimension_numbers=("NCHW", "OIHW", "NCHW"))
    bn_out = (conv - r_mean) / jnp.sqrt(r_var + BN_EPS) * gamma + beta
    return x_ca * jax.nn.sigmoid(bn_out)


if __name__ == "__main__":
    B, C, H, W = 2, 32, 16, 16
    reduction_ratio = 16
    hid = C // reduction_ratio

    key = jax.random.PRNGKey(0)
    kx, k1, k2, k3, k4, k5 = jax.random.split(key, 6)
    x = jax.random.normal(kx, (B, C, H, W), jnp.float32)

    # Deterministic synthetic parameters (shapes per the PyTorch __init__).
    w1 = 0.2 * jax.random.normal(k1, (hid, C), jnp.float32)        # Linear(C -> C//r)
    b1 = 0.1 * jax.random.normal(k2, (hid,), jnp.float32)
    w2 = 0.2 * jax.random.normal(k3, (C, hid), jnp.float32)        # Linear(C//r -> C)
    b2 = 0.1 * jax.random.normal(k4, (C,), jnp.float32)
    wconv = 0.2 * jax.random.normal(k5, (1, 2, KSIZE, KSIZE), jnp.float32)  # Conv2d(2->1, 7x7, no bias)
    bn = jnp.array([1.0, 0.0, 0.0, 1.0], jnp.float32)  # gamma, beta, running_mean, running_var

    params = (w1, b1, w2, b2, wconv, bn)

    out = cbam_forward(x, params)
    out = jax.block_until_ready(out)

    ref = cbam_reference(x, params)
    assert out.shape == x.shape
    max_err = float(jnp.max(jnp.abs(out - ref)))
    assert jnp.allclose(out, ref, atol=5e-4, rtol=5e-4), max_err
    print("KERNEL_OK")
</pallas_src>

<mosaic_0001>
module attributes {stable_mosaic.version = 11 : i64} {
  func.func @kernel(%arg0: i32, %arg1: memref<1x32x256xf32, #tpu.memory_space<vmem>>, %arg2: memref<2x32xf32, #tpu.memory_space<vmem>>, %arg3: memref<2x1xf32, #tpu.memory_space<vmem>>, %arg4: memref<32x2xf32, #tpu.memory_space<vmem>>, %arg5: memref<32x1xf32, #tpu.memory_space<vmem>>, %arg6: memref<1x256xi32, #tpu.memory_space<vmem>>, %arg7: memref<1x256xi32, #tpu.memory_space<vmem>>, %arg8: memref<98xf32, #tpu.memory_space<smem>>, %arg9: memref<4xf32, #tpu.memory_space<smem>>, %arg10: memref<1x32x256xf32, #tpu.memory_space<vmem>>) attributes {dimension_semantics = [#tpu.dimension_semantics<parallel>], iteration_bounds = array<i64: 2>, scalar_prefetch = 0 : i64, scratch_operands = 0 : i64, tpu.core_type = #tpu.core_type<tc>, window_params = [{transform_indices = @transform_0, window_bounds = array<i64: 1, 32, 256>}, {pipeline_mode = #tpu.pipeline_mode<synchronous>, transform_indices = @transform_1, window_bounds = array<i64: 2, 32>}, {pipeline_mode = #tpu.pipeline_mode<synchronous>, transform_indices = @transform_2, window_bounds = array<i64: 2, 1>}, {pipeline_mode = #tpu.pipeline_mode<synchronous>, transform_indices = @transform_3, window_bounds = array<i64: 32, 2>}, {pipeline_mode = #tpu.pipeline_mode<synchronous>, transform_indices = @transform_4, window_bounds = array<i64: 32, 1>}, {pipeline_mode = #tpu.pipeline_mode<synchronous>, transform_indices = @transform_5, window_bounds = array<i64: 1, 256>}, {pipeline_mode = #tpu.pipeline_mode<synchronous>, transform_indices = @transform_6, window_bounds = array<i64: 1, 256>}, {transform_indices = @transform_7, window_bounds = array<i64: 98>}, {transform_indices = @transform_8, window_bounds = array<i64: 4>}, {transform_indices = @transform_9, window_bounds = array<i64: 1, 32, 256>}]} {
    %c0 = arith.constant 0 : index
    %c0_0 = arith.constant 0 : index
    %c0_1 = arith.constant 0 : index
    %0 = vector.load %arg1[%c0, %c0_0, %c0_1] : memref<1x32x256xf32, #tpu.memory_space<vmem>>, vector<1x32x256xf32>
    %1 = vector.shape_cast %0 : vector<1x32x256xf32> to vector<32x256xf32>
    %cst = arith.constant 1.000000e+00 : f32
    %2 = vector.broadcast %cst : f32 to vector<256x1xf32>
    %cst_2 = arith.constant dense<0.000000e+00> : vector<32x1xf32>
    %3 = tpu.matmul %1, %2, %cst_2 {dimension_numbers = #tpu.dot_dimension_numbers<[1], [0], [0], [1], [0, 0, 1, 1], [], []>} : vector<32x256xf32>, vector<256x1xf32>, vector<32x1xf32> -> vector<32x1xf32>
    %cst_3 = arith.constant 3.906250e-03 : f32
    %4 = vector.broadcast %cst_3 : f32 to vector<32x1xf32>
    %5 = arith.mulf %3, %4 : vector<32x1xf32>
    %cst_4 = arith.constant dense<0xFF800000> : vector<32xf32>
    %6 = vector.multi_reduction <maximumf>, %1, %cst_4 [1] : vector<32x256xf32> to vector<32xf32>
    %7 = vector.shape_cast %6 : vector<32xf32> to vector<32x1xf32>
    %8 = tpu.iota {dimensions = array<i32: 1>} : vector<32x2xi32>
    %c0_i32 = arith.constant 0 : i32
    %9 = vector.broadcast %c0_i32 : i32 to vector<32x2xi32>
    %10 = arith.cmpi eq, %8, %9 : vector<32x2xi32>
    %11 = vector.shape_cast %5 : vector<32x1xf32> to vector<32x1xf32>
    %12 = vector.broadcast %11 : vector<32x1xf32> to vector<32x2xf32>
    %13 = vector.shape_cast %7 : vector<32x1xf32> to vector<32x1xf32>
    %14 = vector.broadcast %13 : vector<32x1xf32> to vector<32x2xf32>
    %15 = arith.select %10, %12, %14 : vector<32x2xi1>, vector<32x2xf32>
    %c0_5 = arith.constant 0 : index
    %c0_6 = arith.constant 0 : index
    %16 = vector.load %arg2[%c0_5, %c0_6] : memref<2x32xf32, #tpu.memory_space<vmem>>, vector<2x32xf32>
    %c0_7 = arith.constant 0 : index
    %c0_8 = arith.constant 0 : index
    %17 = vector.load %arg3[%c0_7, %c0_8] : memref<2x1xf32, #tpu.memory_space<vmem>>, vector<2x1xf32>
    %c0_9 = arith.constant 0 : index
    %c0_10 = arith.constant 0 : index
    %18 = vector.load %arg4[%c0_9, %c0_10] : memref<32x2xf32, #tpu.memory_space<vmem>>, vector<32x2xf32>
    %c0_11 = arith.constant 0 : index
    %c0_12 = arith.constant 0 : index
    %19 = vector.load %arg5[%c0_11, %c0_12] : memref<32x1xf32, #tpu.memory_space<vmem>>, vector<32x1xf32>
    %cst_13 = arith.constant dense<0.000000e+00> : vector<2x2xf32>
    %20 = tpu.matmul %16, %15, %cst_13 {dimension_numbers = #tpu.dot_dimension_numbers<[1], [0], [0], [1], [0, 0, 1, 1], [], []>} : vector<2x32xf32>, vector<32x2xf32>, vector<2x2xf32> -> vector<2x2xf32>
    %21 = vector.broadcast %17 : vector<2x1xf32> to vector<2x2xf32>
    %22 = arith.addf %20, %21 : vector<2x2xf32>
    %cst_14 = arith.constant 0.000000e+00 : f32
    %23 = vector.broadcast %cst_14 : f32 to vector<2x2xf32>
    %24 = arith.maximumf %22, %23 : vector<2x2xf32>
    %cst_15 = arith.constant dense<0.000000e+00> : vector<32x2xf32>
    %25 = tpu.matmul %18, %24, %cst_15 {dimension_numbers = #tpu.dot_dimension_numbers<[1], [0], [0], [1], [0, 0, 1, 1], [], []>} : vector<32x2xf32>, vector<2x2xf32>, vector<32x2xf32> -> vector<32x2xf32>
    %26 = vector.broadcast %19 : vector<32x1xf32> to vector<32x2xf32>
    %27 = arith.addf %25, %26 : vector<32x2xf32>
    %cst_16 = arith.constant dense<0.000000e+00> : vector<32xf32>
    %28 = vector.multi_reduction <add>, %27, %cst_16 [1] : vector<32x2xf32> to vector<32xf32>
    %29 = vector.shape_cast %28 : vector<32xf32> to vector<32x1xf32>
    %cst_17 = arith.constant 0.000000e+00 : f32
    %30 = vector.broadcast %cst_17 : f32 to vector<32x1xf32>
    %31 = arith.subf %30, %29 : vector<32x1xf32>
    %32 = math.exp %31 : vector<32x1xf32>
    %cst_18 = arith.constant 1.000000e+00 : f32
    %33 = vector.broadcast %cst_18 : f32 to vector<32x1xf32>
    %34 = arith.addf %33, %32 : vector<32x1xf32>
    %cst_19 = arith.constant 1.000000e+00 : f32
    %35 = vector.broadcast %cst_19 : f32 to vector<32x1xf32>
    %36 = arith.divf %35, %34 : vector<32x1xf32>
    %37 = vector.broadcast %36 : vector<32x1xf32> to vector<32x256xf32>
    %38 = arith.mulf %1, %37 : vector<32x256xf32>
    %cst_20 = arith.constant dense<0xFF800000> : vector<256xf32>
    %39 = vector.multi_reduction <maximumf>, %38, %cst_20 [0] : vector<32x256xf32> to vector<256xf32>
    %40 = vector.shape_cast %39 : vector<256xf32> to vector<1x256xf32>
    %cst_21 = arith.constant 3.125000e-02 : f32
    %41 = vector.broadcast %cst_21 : f32 to vector<1x32xf32>
    %cst_22 = arith.constant dense<0.000000e+00> : vector<1x256xf32>
    %42 = tpu.matmul %41, %38, %cst_22 {dimension_numbers = #tpu.dot_dimension_numbers<[1], [0], [0], [1], [0, 0, 1, 1], [], []>} : vector<1x32xf32>, vector<32x256xf32>, vector<1x256xf32> -> vector<1x256xf32>
    %c0_23 = arith.constant 0 : index
    %c0_24 = arith.constant 0 : index
    %43 = vector.load %arg6[%c0_23, %c0_24] : memref<1x256xi32, #tpu.memory_space<vmem>>, vector<1x256xi32>
    %c0_25 = arith.constant 0 : index
    %c0_26 = arith.constant 0 : index
    %44 = vector.load %arg7[%c0_25, %c0_26] : memref<1x256xi32, #tpu.memory_space<vmem>>, vector<1x256xi32>
    %c-3_i32 = arith.constant -3 : i32
    %45 = vector.broadcast %c-3_i32 : i32 to vector<1x256xi32>
    %46 = arith.addi %43, %45 : vector<1x256xi32>
    %c0_i32_27 = arith.constant 0 : i32
    %47 = vector.broadcast %c0_i32_27 : i32 to vector<1x256xi32>
    %48 = arith.cmpi sge, %46, %47 : vector<1x256xi32>
    %c16_i32 = arith.constant 16 : i32
    %49 = vector.broadcast %c16_i32 : i32 to vector<1x256xi32>
    %50 = arith.cmpi slt, %46, %49 : vector<1x256xi32>
    %51 = arith.andi %48, %50 : vector<1x256xi1>
    %c3_i32 = arith.constant 3 : i32
    %52 = tpu.dynamic_rotate %40 by %c3_i32 dim 1 : vector<1x256xf32>, i32 -> vector<1x256xf32>
    %cst_28 = arith.constant 0.000000e+00 : f32
    %53 = vector.broadcast %cst_28 : f32 to vector<1x256xf32>
    %54 = arith.select %51, %52, %53 : vector<1x256xi1>, vector<1x256xf32>
    %c3_i32_29 = arith.constant 3 : i32
    %55 = tpu.dynamic_rotate %42 by %c3_i32_29 dim 1 : vector<1x256xf32>, i32 -> vector<1x256xf32>
    %cst_30 = arith.constant 0.000000e+00 : f32
    %56 = vector.broadcast %cst_30 : f32 to vector<1x256xf32>
    %57 = arith.select %51, %55, %56 : vector<1x256xi1>, vector<1x256xf32>
    %c-2_i32 = arith.constant -2 : i32
    %58 = vector.broadcast %c-2_i32 : i32 to vector<1x256xi32>
    %59 = arith.addi %43, %58 : vector<1x256xi32>
    %c0_i32_31 = arith.constant 0 : i32
    %60 = vector.broadcast %c0_i32_31 : i32 to vector<1x256xi32>
    %61 = arith.cmpi sge, %59, %60 : vector<1x256xi32>
    %c16_i32_32 = arith.constant 16 : i32
    %62 = vector.broadcast %c16_i32_32 : i32 to vector<1x256xi32>
    %63 = arith.cmpi slt, %59, %62 : vector<1x256xi32>
    %64 = arith.andi %61, %63 : vector<1x256xi1>
    %c2_i32 = arith.constant 2 : i32
    %65 = tpu.dynamic_rotate %40 by %c2_i32 dim 1 : vector<1x256xf32>, i32 -> vector<1x256xf32>
    %cst_33 = arith.constant 0.000000e+00 : f32
    %66 = vector.broadcast %cst_33 : f32 to vector<1x256xf32>
    %67 = arith.select %64, %65, %66 : vector<1x256xi1>, vector<1x256xf32>
    %c2_i32_34 = arith.constant 2 : i32
    %68 = tpu.dynamic_rotate %42 by %c2_i32_34 dim 1 : vector<1x256xf32>, i32 -> vector<1x256xf32>
    %cst_35 = arith.constant 0.000000e+00 : f32
    %69 = vector.broadcast %cst_35 : f32 to vector<1x256xf32>
    %70 = arith.select %64, %68, %69 : vector<1x256xi1>, vector<1x256xf32>
    %c-1_i32 = arith.constant -1 : i32
    %71 = vector.broadcast %c-1_i32 : i32 to vector<1x256xi32>
    %72 = arith.addi %43, %71 : vector<1x256xi32>
    %c0_i32_36 = arith.constant 0 : i32
    %73 = vector.broadcast %c0_i32_36 : i32 to vector<1x256xi32>
    %74 = arith.cmpi sge, %72, %73 : vector<1x256xi32>
    %c16_i32_37 = arith.constant 16 : i32
    %75 = vector.broadcast %c16_i32_37 : i32 to vector<1x256xi32>
    %76 = arith.cmpi slt, %72, %75 : vector<1x256xi32>
    %77 = arith.andi %74, %76 : vector<1x256xi1>
    %c1_i32 = arith.constant 1 : i32
    %78 = tpu.dynamic_rotate %40 by %c1_i32 dim 1 : vector<1x256xf32>, i32 -> vector<1x256xf32>
    %cst_38 = arith.constant 0.000000e+00 : f32
    %79 = vector.broadcast %cst_38 : f32 to vector<1x256xf32>
    %80 = arith.select %77, %78, %79 : vector<1x256xi1>, vector<1x256xf32>
    %c1_i32_39 = arith.constant 1 : i32
    %81 = tpu.dynamic_rotate %42 by %c1_i32_39 dim 1 : vector<1x256xf32>, i32 -> vector<1x256xf32>
    %cst_40 = arith.constant 0.000000e+00 : f32
    %82 = vector.broadcast %cst_40 : f32 to vector<1x256xf32>
    %83 = arith.select %77, %81, %82 : vector<1x256xi1>, vector<1x256xf32>
    %c1_i32_41 = arith.constant 1 : i32
    %84 = vector.broadcast %c1_i32_41 : i32 to vector<1x256xi32>
    %85 = arith.addi %43, %84 : vector<1x256xi32>
    %c0_i32_42 = arith.constant 0 : i32
    %86 = vector.broadcast %c0_i32_42 : i32 to vector<1x256xi32>
    %87 = arith.cmpi sge, %85, %86 : vector<1x256xi32>
    %c16_i32_43 = arith.constant 16 : i32
    %88 = vector.broadcast %c16_i32_43 : i32 to vector<1x256xi32>
    %89 = arith.cmpi slt, %85, %88 : vector<1x256xi32>
    %90 = arith.andi %87, %89 : vector<1x256xi1>
    %c255_i32 = arith.constant 255 : i32
    %91 = tpu.dynamic_rotate %40 by %c255_i32 dim 1 : vector<1x256xf32>, i32 -> vector<1x256xf32>
    %cst_44 = arith.constant 0.000000e+00 : f32
    %92 = vector.broadcast %cst_44 : f32 to vector<1x256xf32>
    %93 = arith.select %90, %91, %92 : vector<1x256xi1>, vector<1x256xf32>
    %c255_i32_45 = arith.constant 255 : i32
    %94 = tpu.dynamic_rotate %42 by %c255_i32_45 dim 1 : vector<1x256xf32>, i32 -> vector<1x256xf32>
    %cst_46 = arith.constant 0.000000e+00 : f32
    %95 = vector.broadcast %cst_46 : f32 to vector<1x256xf32>
    %96 = arith.select %90, %94, %95 : vector<1x256xi1>, vector<1x256xf32>
    %c2_i32_47 = arith.constant 2 : i32
    %97 = vector.broadcast %c2_i32_47 : i32 to vector<1x256xi32>
    %98 = arith.addi %43, %97 : vector<1x256xi32>
    %c0_i32_48 = arith.constant 0 : i32
    %99 = vector.broadcast %c0_i32_48 : i32 to vector<1x256xi32>
    %100 = arith.cmpi sge, %98, %99 : vector<1x256xi32>
    %c16_i32_49 = arith.constant 16 : i32
    %101 = vector.broadcast %c16_i32_49 : i32 to vector<1x256xi32>
    %102 = arith.cmpi slt, %98, %101 : vector<1x256xi32>
    %103 = arith.andi %100, %102 : vector<1x256xi1>
    %c254_i32 = arith.constant 254 : i32
    %104 = tpu.dynamic_rotate %40 by %c254_i32 dim 1 : vector<1x256xf32>, i32 -> vector<1x256xf32>
    %cst_50 = arith.constant 0.000000e+00 : f32
    %105 = vector.broadcast %cst_50 : f32 to vector<1x256xf32>
    %106 = arith.select %103, %104, %105 : vector<1x256xi1>, vector<1x256xf32>
    %c254_i32_51 = arith.constant 254 : i32
    %107 = tpu.dynamic_rotate %42 by %c254_i32_51 dim 1 : vector<1x256xf32>, i32 -> vector<1x256xf32>
    %cst_52 = arith.constant 0.000000e+00 : f32
    %108 = vector.broadcast %cst_52 : f32 to vector<1x256xf32>
    %109 = arith.select %103, %107, %108 : vector<1x256xi1>, vector<1x256xf32>
    %c3_i32_53 = arith.constant 3 : i32
    %110 = vector.broadcast %c3_i32_53 : i32 to vector<1x256xi32>
    %111 = arith.addi %43, %110 : vector<1x256xi32>
    %c0_i32_54 = arith.constant 0 : i32
    %112 = vector.broadcast %c0_i32_54 : i32 to vector<1x256xi32>
    %113 = arith.cmpi sge, %111, %112 : vector<1x256xi32>
    %c16_i32_55 = arith.constant 16 : i32
    %114 = vector.broadcast %c16_i32_55 : i32 to vector<1x256xi32>
    %115 = arith.cmpi slt, %111, %114 : vector<1x256xi32>
    %116 = arith.andi %113, %115 : vector<1x256xi1>
    %c253_i32 = arith.constant 253 : i32
    %117 = tpu.dynamic_rotate %40 by %c253_i32 dim 1 : vector<1x256xf32>, i32 -> vector<1x256xf32>
    %cst_56 = arith.constant 0.000000e+00 : f32
    %118 = vector.broadcast %cst_56 : f32 to vector<1x256xf32>
    %119 = arith.select %116, %117, %118 : vector<1x256xi1>, vector<1x256xf32>
    %c253_i32_57 = arith.constant 253 : i32
    %120 = tpu.dynamic_rotate %42 by %c253_i32_57 dim 1 : vector<1x256xf32>, i32 -> vector<1x256xf32>
    %cst_58 = arith.constant 0.000000e+00 : f32
    %121 = vector.broadcast %cst_58 : f32 to vector<1x256xf32>
    %122 = arith.select %116, %120, %121 : vector<1x256xi1>, vector<1x256xf32>
    %cst_59 = arith.constant 0.000000e+00 : f32
    %123 = vector.broadcast %cst_59 : f32 to vector<1x256xf32>
    %cst_60 = arith.constant 0.000000e+00 : f32
    %124 = vector.broadcast %cst_60 : f32 to vector<1x256xf32>
    %cst_61 = arith.constant 0.000000e+00 : f32
    %125 = vector.broadcast %cst_61 : f32 to vector<1x256xf32>
    %cst_62 = arith.constant 0.000000e+00 : f32
    %126 = vector.broadcast %cst_62 : f32 to vector<1x256xf32>
    %c0_63 = arith.constant 0 : index
    %127 = memref.load %arg8[%c0_63] : memref<98xf32, #tpu.memory_space<smem>>
    %128 = vector.broadcast %127 : f32 to vector<1x256xf32>
    %129 = arith.mulf %128, %54 : vector<1x256xf32>
    %130 = arith.addf %125, %129 : vector<1x256xf32>
    %c1 = arith.constant 1 : index
    %131 = memref.load %arg8[%c1] : memref<98xf32, #tpu.memory_space<smem>>
    %132 = vector.broadcast %131 : f32 to vector<1x256xf32>
    %133 = arith.mulf %132, %67 : vector<1x256xf32>
    %134 = arith.addf %126, %133 : vector<1x256xf32>
    %c2 = arith.constant 2 : index
    %135 = memref.load %arg8[%c2] : memref<98xf32, #tpu.memory_space<smem>>
    %136 = vector.broadcast %135 : f32 to vector<1x256xf32>
    %137 = arith.mulf %136, %80 : vector<1x256xf32>
    %138 = arith.addf %130, %137 : vector<1x256xf32>
    %c3 = arith.constant 3 : index
    %139 = memref.load %arg8[%c3] : memref<98xf32, #tpu.memory_space<smem>>
    %140 = vector.broadcast %139 : f32 to vector<1x256xf32>
    %141 = arith.mulf %140, %40 : vector<1x256xf32>
    %142 = arith.addf %134, %141 : vector<1x256xf32>
    %c4 = arith.constant 4 : index
    %143 = memref.load %arg8[%c4] : memref<98xf32, #tpu.memory_space<smem>>
    %144 = vector.broadcast %143 : f32 to vector<1x256xf32>
    %145 = arith.mulf %144, %93 : vector<1x256xf32>
    %146 = arith.addf %138, %145 : vector<1x256xf32>
    %c5 = arith.constant 5 : index
    %147 = memref.load %arg8[%c5] : memref<98xf32, #tpu.memory_space<smem>>
    %148 = vector.broadcast %147 : f32 to vector<1x256xf32>
    %149 = arith.mulf %148, %106 : vector<1x256xf32>
    %150 = arith.addf %142, %149 : vector<1x256xf32>
    %c6 = arith.constant 6 : index
    %151 = memref.load %arg8[%c6] : memref<98xf32, #tpu.memory_space<smem>>
    %152 = vector.broadcast %151 : f32 to vector<1x256xf32>
    %153 = arith.mulf %152, %119 : vector<1x256xf32>
    %154 = arith.addf %146, %153 : vector<1x256xf32>
    %c49 = arith.constant 49 : index
    %155 = memref.load %arg8[%c49] : memref<98xf32, #tpu.memory_space<smem>>
    %156 = vector.broadcast %155 : f32 to vector<1x256xf32>
    %157 = arith.mulf %156, %57 : vector<1x256xf32>
    %158 = arith.addf %154, %157 : vector<1x256xf32>
    %c50 = arith.constant 50 : index
    %159 = memref.load %arg8[%c50] : memref<98xf32, #tpu.memory_space<smem>>
    %160 = vector.broadcast %159 : f32 to vector<1x256xf32>
    %161 = arith.mulf %160, %70 : vector<1x256xf32>
    %162 = arith.addf %150, %161 : vector<1x256xf32>
    %c51 = arith.constant 51 : index
    %163 = memref.load %arg8[%c51] : memref<98xf32, #tpu.memory_space<smem>>
    %164 = vector.broadcast %163 : f32 to vector<1x256xf32>
    %165 = arith.mulf %164, %83 : vector<1x256xf32>
    %166 = arith.addf %158, %165 : vector<1x256xf32>
    %c52 = arith.constant 52 : index
    %167 = memref.load %arg8[%c52] : memref<98xf32, #tpu.memory_space<smem>>
    %168 = vector.broadcast %167 : f32 to vector<1x256xf32>
    %169 = arith.mulf %168, %42 : vector<1x256xf32>
    %170 = arith.addf %162, %169 : vector<1x256xf32>
    %c53 = arith.constant 53 : index
    %171 = memref.load %arg8[%c53] : memref<98xf32, #tpu.memory_space<smem>>
    %172 = vector.broadcast %171 : f32 to vector<1x256xf32>
    %173 = arith.mulf %172, %96 : vector<1x256xf32>
    %174 = arith.addf %166, %173 : vector<1x256xf32>
    %c54 = arith.constant 54 : index
    %175 = memref.load %arg8[%c54] : memref<98xf32, #tpu.memory_space<smem>>
    %176 = vector.broadcast %175 : f32 to vector<1x256xf32>
    %177 = arith.mulf %176, %109 : vector<1x256xf32>
    %178 = arith.addf %170, %177 : vector<1x256xf32>
    %c55 = arith.constant 55 : index
    %179 = memref.load %arg8[%c55] : memref<98xf32, #tpu.memory_space<smem>>
    %180 = vector.broadcast %179 : f32 to vector<1x256xf32>
    %181 = arith.mulf %180, %122 : vector<1x256xf32>
    %182 = arith.addf %174, %181 : vector<1x256xf32>
    %183 = arith.addf %182, %178 : vector<1x256xf32>
    %c48_i32 = arith.constant 48 : i32
    %184 = tpu.dynamic_rotate %183 by %c48_i32 dim 1 : vector<1x256xf32>, i32 -> vector<1x256xf32>
    %c-3_i32_64 = arith.constant -3 : i32
    %185 = vector.broadcast %c-3_i32_64 : i32 to vector<1x256xi32>
    %186 = arith.addi %44, %185 : vector<1x256xi32>
    %c0_i32_65 = arith.constant 0 : i32
    %187 = vector.broadcast %c0_i32_65 : i32 to vector<1x256xi32>
    %188 = arith.cmpi sge, %186, %187 : vector<1x256xi32>
    %c16_i32_66 = arith.constant 16 : i32
    %189 = vector.broadcast %c16_i32_66 : i32 to vector<1x256xi32>
    %190 = arith.cmpi slt, %186, %189 : vector<1x256xi32>
    %191 = arith.andi %188, %190 : vector<1x256xi1>
    %cst_67 = arith.constant 0.000000e+00 : f32
    %192 = vector.broadcast %cst_67 : f32 to vector<1x256xf32>
    %193 = arith.select %191, %184, %192 : vector<1x256xi1>, vector<1x256xf32>
    %194 = arith.addf %123, %193 : vector<1x256xf32>
    %cst_68 = arith.constant 0.000000e+00 : f32
    %195 = vector.broadcast %cst_68 : f32 to vector<1x256xf32>
    %cst_69 = arith.constant 0.000000e+00 : f32
    %196 = vector.broadcast %cst_69 : f32 to vector<1x256xf32>
    %c7 = arith.constant 7 : index
    %197 = memref.load %arg8[%c7] : memref<98xf32, #tpu.memory_space<smem>>
    %198 = vector.broadcast %197 : f32 to vector<1x256xf32>
    %199 = arith.mulf %198, %54 : vector<1x256xf32>
    %200 = arith.addf %195, %199 : vector<1x256xf32>
    %c8 = arith.constant 8 : index
    %201 = memref.load %arg8[%c8] : memref<98xf32, #tpu.memory_space<smem>>
    %202 = vector.broadcast %201 : f32 to vector<1x256xf32>
    %203 = arith.mulf %202, %67 : vector<1x256xf32>
    %204 = arith.addf %196, %203 : vector<1x256xf32>
    %c9 = arith.constant 9 : index
    %205 = memref.load %arg8[%c9] : memref<98xf32, #tpu.memory_space<smem>>
    %206 = vector.broadcast %205 : f32 to vector<1x256xf32>
    %207 = arith.mulf %206, %80 : vector<1x256xf32>
    %208 = arith.addf %200, %207 : vector<1x256xf32>
    %c10 = arith.constant 10 : index
    %209 = memref.load %arg8[%c10] : memref<98xf32, #tpu.memory_space<smem>>
    %210 = vector.broadcast %209 : f32 to vector<1x256xf32>
    %211 = arith.mulf %210, %40 : vector<1x256xf32>
    %212 = arith.addf %204, %211 : vector<1x256xf32>
    %c11 = arith.constant 11 : index
    %213 = memref.load %arg8[%c11] : memref<98xf32, #tpu.memory_space<smem>>
    %214 = vector.broadcast %213 : f32 to vector<1x256xf32>
    %215 = arith.mulf %214, %93 : vector<1x256xf32>
    %216 = arith.addf %208, %215 : vector<1x256xf32>
    %c12 = arith.constant 12 : index
    %217 = memref.load %arg8[%c12] : memref<98xf32, #tpu.memory_space<smem>>
    %218 = vector.broadcast %217 : f32 to vector<1x256xf32>
    %219 = arith.mulf %218, %106 : vector<1x256xf32>
    %220 = arith.addf %212, %219 : vector<1x256xf32>
    %c13 = arith.constant 13 : index
    %221 = memref.load %arg8[%c13] : memref<98xf32, #tpu.memory_space<smem>>
    %222 = vector.broadcast %221 : f32 to vector<1x256xf32>
    %223 = arith.mulf %222, %119 : vector<1x256xf32>
    %224 = arith.addf %216, %223 : vector<1x256xf32>
    %c56 = arith.constant 56 : index
    %225 = memref.load %arg8[%c56] : memref<98xf32, #tpu.memory_space<smem>>
    %226 = vector.broadcast %225 : f32 to vector<1x256xf32>
    %227 = arith.mulf %226, %57 : vector<1x256xf32>
    %228 = arith.addf %224, %227 : vector<1x256xf32>
    %c57 = arith.constant 57 : index
    %229 = memref.load %arg8[%c57] : memref<98xf32, #tpu.memory_space<smem>>
    %230 = vector.broadcast %229 : f32 to vector<1x256xf32>
    %231 = arith.mulf %230, %70 : vector<1x256xf32>
    %232 = arith.addf %220, %231 : vector<1x256xf32>
    %c58 = arith.constant 58 : index
    %233 = memref.load %arg8[%c58] : memref<98xf32, #tpu.memory_space<smem>>
    %234 = vector.broadcast %233 : f32 to vector<1x256xf32>
    %235 = arith.mulf %234, %83 : vector<1x256xf32>
    %236 = arith.addf %228, %235 : vector<1x256xf32>
    %c59 = arith.constant 59 : index
    %237 = memref.load %arg8[%c59] : memref<98xf32, #tpu.memory_space<smem>>
    %238 = vector.broadcast %237 : f32 to vector<1x256xf32>
    %239 = arith.mulf %238, %42 : vector<1x256xf32>
    %240 = arith.addf %232, %239 : vector<1x256xf32>
    %c60 = arith.constant 60 : index
    %241 = memref.load %arg8[%c60] : memref<98xf32, #tpu.memory_space<smem>>
    %242 = vector.broadcast %241 : f32 to vector<1x256xf32>
    %243 = arith.mulf %242, %96 : vector<1x256xf32>
    %244 = arith.addf %236, %243 : vector<1x256xf32>
    %c61 = arith.constant 61 : index
    %245 = memref.load %arg8[%c61] : memref<98xf32, #tpu.memory_space<smem>>
    %246 = vector.broadcast %245 : f32 to vector<1x256xf32>
    %247 = arith.mulf %246, %109 : vector<1x256xf32>
    %248 = arith.addf %240, %247 : vector<1x256xf32>
    %c62 = arith.constant 62 : index
    %249 = memref.load %arg8[%c62] : memref<98xf32, #tpu.memory_space<smem>>
    %250 = vector.broadcast %249 : f32 to vector<1x256xf32>
    %251 = arith.mulf %250, %122 : vector<1x256xf32>
    %252 = arith.addf %244, %251 : vector<1x256xf32>
    %253 = arith.addf %252, %248 : vector<1x256xf32>
    %c32_i32 = arith.constant 32 : i32
    %254 = tpu.dynamic_rotate %253 by %c32_i32 dim 1 : vector<1x256xf32>, i32 -> vector<1x256xf32>
    %c-2_i32_70 = arith.constant -2 : i32
    %255 = vector.broadcast %c-2_i32_70 : i32 to vector<1x256xi32>
    %256 = arith.addi %44, %255 : vector<1x256xi32>
    %c0_i32_71 = arith.constant 0 : i32
    %257 = vector.broadcast %c0_i32_71 : i32 to vector<1x256xi32>
    %258 = arith.cmpi sge, %256, %257 : vector<1x256xi32>
    %c16_i32_72 = arith.constant 16 : i32
    %259 = vector.broadcast %c16_i32_72 : i32 to vector<1x256xi32>
    %260 = arith.cmpi slt, %256, %259 : vector<1x256xi32>
    %261 = arith.andi %258, %260 : vector<1x256xi1>
    %cst_73 = arith.constant 0.000000e+00 : f32
    %262 = vector.broadcast %cst_73 : f32 to vector<1x256xf32>
    %263 = arith.select %261, %254, %262 : vector<1x256xi1>, vector<1x256xf32>
    %264 = arith.addf %124, %263 : vector<1x256xf32>
    %cst_74 = arith.constant 0.000000e+00 : f32
    %265 = vector.broadcast %cst_74 : f32 to vector<1x256xf32>
    %cst_75 = arith.constant 0.000000e+00 : f32
    %266 = vector.broadcast %cst_75 : f32 to vector<1x256xf32>
    %c14 = arith.constant 14 : index
    %267 = memref.load %arg8[%c14] : memref<98xf32, #tpu.memory_space<smem>>
    %268 = vector.broadcast %267 : f32 to vector<1x256xf32>
    %269 = arith.mulf %268, %54 : vector<1x256xf32>
    %270 = arith.addf %265, %269 : vector<1x256xf32>
    %c15 = arith.constant 15 : index
    %271 = memref.load %arg8[%c15] : memref<98xf32, #tpu.memory_space<smem>>
    %272 = vector.broadcast %271 : f32 to vector<1x256xf32>
    %273 = arith.mulf %272, %67 : vector<1x256xf32>
    %274 = arith.addf %266, %273 : vector<1x256xf32>
    %c16 = arith.constant 16 : index
    %275 = memref.load %arg8[%c16] : memref<98xf32, #tpu.memory_space<smem>>
    %276 = vector.broadcast %275 : f32 to vector<1x256xf32>
    %277 = arith.mulf %276, %80 : vector<1x256xf32>
    %278 = arith.addf %270, %277 : vector<1x256xf32>
    %c17 = arith.constant 17 : index
    %279 = memref.load %arg8[%c17] : memref<98xf32, #tpu.memory_space<smem>>
    %280 = vector.broadcast %279 : f32 to vector<1x256xf32>
    %281 = arith.mulf %280, %40 : vector<1x256xf32>
    %282 = arith.addf %274, %281 : vector<1x256xf32>
    %c18 = arith.constant 18 : index
    %283 = memref.load %arg8[%c18] : memref<98xf32, #tpu.memory_space<smem>>
    %284 = vector.broadcast %283 : f32 to vector<1x256xf32>
    %285 = arith.mulf %284, %93 : vector<1x256xf32>
    %286 = arith.addf %278, %285 : vector<1x256xf32>
    %c19 = arith.constant 19 : index
    %287 = memref.load %arg8[%c19] : memref<98xf32, #tpu.memory_space<smem>>
    %288 = vector.broadcast %287 : f32 to vector<1x256xf32>
    %289 = arith.mulf %288, %106 : vector<1x256xf32>
    %290 = arith.addf %282, %289 : vector<1x256xf32>
    %c20 = arith.constant 20 : index
    %291 = memref.load %arg8[%c20] : memref<98xf32, #tpu.memory_space<smem>>
    %292 = vector.broadcast %291 : f32 to vector<1x256xf32>
    %293 = arith.mulf %292, %119 : vector<1x256xf32>
    %294 = arith.addf %286, %293 : vector<1x256xf32>
    %c63 = arith.constant 63 : index
    %295 = memref.load %arg8[%c63] : memref<98xf32, #tpu.memory_space<smem>>
    %296 = vector.broadcast %295 : f32 to vector<1x256xf32>
    %297 = arith.mulf %296, %57 : vector<1x256xf32>
    %298 = arith.addf %294, %297 : vector<1x256xf32>
    %c64 = arith.constant 64 : index
    %299 = memref.load %arg8[%c64] : memref<98xf32, #tpu.memory_space<smem>>
    %300 = vector.broadcast %299 : f32 to vector<1x256xf32>
    %301 = arith.mulf %300, %70 : vector<1x256xf32>
    %302 = arith.addf %290, %301 : vector<1x256xf32>
    %c65 = arith.constant 65 : index
    %303 = memref.load %arg8[%c65] : memref<98xf32, #tpu.memory_space<smem>>
    %304 = vector.broadcast %303 : f32 to vector<1x256xf32>
    %305 = arith.mulf %304, %83 : vector<1x256xf32>
    %306 = arith.addf %298, %305 : vector<1x256xf32>
    %c66 = arith.constant 66 : index
    %307 = memref.load %arg8[%c66] : memref<98xf32, #tpu.memory_space<smem>>
    %308 = vector.broadcast %307 : f32 to vector<1x256xf32>
    %309 = arith.mulf %308, %42 : vector<1x256xf32>
    %310 = arith.addf %302, %309 : vector<1x256xf32>
    %c67 = arith.constant 67 : index
    %311 = memref.load %arg8[%c67] : memref<98xf32, #tpu.memory_space<smem>>
    %312 = vector.broadcast %311 : f32 to vector<1x256xf32>
    %313 = arith.mulf %312, %96 : vector<1x256xf32>
    %314 = arith.addf %306, %313 : vector<1x256xf32>
    %c68 = arith.constant 68 : index
    %315 = memref.load %arg8[%c68] : memref<98xf32, #tpu.memory_space<smem>>
    %316 = vector.broadcast %315 : f32 to vector<1x256xf32>
    %317 = arith.mulf %316, %109 : vector<1x256xf32>
    %318 = arith.addf %310, %317 : vector<1x256xf32>
    %c69 = arith.constant 69 : index
    %319 = memref.load %arg8[%c69] : memref<98xf32, #tpu.memory_space<smem>>
    %320 = vector.broadcast %319 : f32 to vector<1x256xf32>
    %321 = arith.mulf %320, %122 : vector<1x256xf32>
    %322 = arith.addf %314, %321 : vector<1x256xf32>
    %323 = arith.addf %322, %318 : vector<1x256xf32>
    %c16_i32_76 = arith.constant 16 : i32
    %324 = tpu.dynamic_rotate %323 by %c16_i32_76 dim 1 : vector<1x256xf32>, i32 -> vector<1x256xf32>
    %c-1_i32_77 = arith.constant -1 : i32
    %325 = vector.broadcast %c-1_i32_77 : i32 to vector<1x256xi32>
    %326 = arith.addi %44, %325 : vector<1x256xi32>
    %c0_i32_78 = arith.constant 0 : i32
    %327 = vector.broadcast %c0_i32_78 : i32 to vector<1x256xi32>
    %328 = arith.cmpi sge, %326, %327 : vector<1x256xi32>
    %c16_i32_79 = arith.constant 16 : i32
    %329 = vector.broadcast %c16_i32_79 : i32 to vector<1x256xi32>
    %330 = arith.cmpi slt, %326, %329 : vector<1x256xi32>
    %331 = arith.andi %328, %330 : vector<1x256xi1>
    %cst_80 = arith.constant 0.000000e+00 : f32
    %332 = vector.broadcast %cst_80 : f32 to vector<1x256xf32>
    %333 = arith.select %331, %324, %332 : vector<1x256xi1>, vector<1x256xf32>
    %334 = arith.addf %194, %333 : vector<1x256xf32>
    %cst_81 = arith.constant 0.000000e+00 : f32
    %335 = vector.broadcast %cst_81 : f32 to vector<1x256xf32>
    %cst_82 = arith.constant 0.000000e+00 : f32
    %336 = vector.broadcast %cst_82 : f32 to vector<1x256xf32>
    %c21 = arith.constant 21 : index
    %337 = memref.load %arg8[%c21] : memref<98xf32, #tpu.memory_space<smem>>
    %338 = vector.broadcast %337 : f32 to vector<1x256xf32>
    %339 = arith.mulf %338, %54 : vector<1x256xf32>
    %340 = arith.addf %335, %339 : vector<1x256xf32>
    %c22 = arith.constant 22 : index
    %341 = memref.load %arg8[%c22] : memref<98xf32, #tpu.memory_space<smem>>
    %342 = vector.broadcast %341 : f32 to vector<1x256xf32>
    %343 = arith.mulf %342, %67 : vector<1x256xf32>
    %344 = arith.addf %336, %343 : vector<1x256xf32>
    %c23 = arith.constant 23 : index
    %345 = memref.load %arg8[%c23] : memref<98xf32, #tpu.memory_space<smem>>
    %346 = vector.broadcast %345 : f32 to vector<1x256xf32>
    %347 = arith.mulf %346, %80 : vector<1x256xf32>
    %348 = arith.addf %340, %347 : vector<1x256xf32>
    %c24 = arith.constant 24 : index
    %349 = memref.load %arg8[%c24] : memref<98xf32, #tpu.memory_space<smem>>
    %350 = vector.broadcast %349 : f32 to vector<1x256xf32>
    %351 = arith.mulf %350, %40 : vector<1x256xf32>
    %352 = arith.addf %344, %351 : vector<1x256xf32>
    %c25 = arith.constant 25 : index
    %353 = memref.load %arg8[%c25] : memref<98xf32, #tpu.memory_space<smem>>
    %354 = vector.broadcast %353 : f32 to vector<1x256xf32>
    %355 = arith.mulf %354, %93 : vector<1x256xf32>
    %356 = arith.addf %348, %355 : vector<1x256xf32>
    %c26 = arith.constant 26 : index
    %357 = memref.load %arg8[%c26] : memref<98xf32, #tpu.memory_space<smem>>
    %358 = vector.broadcast %357 : f32 to vector<1x256xf32>
    %359 = arith.mulf %358, %106 : vector<1x256xf32>
    %360 = arith.addf %352, %359 : vector<1x256xf32>
    %c27 = arith.constant 27 : index
    %361 = memref.load %arg8[%c27] : memref<98xf32, #tpu.memory_space<smem>>
    %362 = vector.broadcast %361 : f32 to vector<1x256xf32>
    %363 = arith.mulf %362, %119 : vector<1x256xf32>
    %364 = arith.addf %356, %363 : vector<1x256xf32>
    %c70 = arith.constant 70 : index
    %365 = memref.load %arg8[%c70] : memref<98xf32, #tpu.memory_space<smem>>
    %366 = vector.broadcast %365 : f32 to vector<1x256xf32>
    %367 = arith.mulf %366, %57 : vector<1x256xf32>
    %368 = arith.addf %364, %367 : vector<1x256xf32>
    %c71 = arith.constant 71 : index
    %369 = memref.load %arg8[%c71] : memref<98xf32, #tpu.memory_space<smem>>
    %370 = vector.broadcast %369 : f32 to vector<1x256xf32>
    %371 = arith.mulf %370, %70 : vector<1x256xf32>
    %372 = arith.addf %360, %371 : vector<1x256xf32>
    %c72 = arith.constant 72 : index
    %373 = memref.load %arg8[%c72] : memref<98xf32, #tpu.memory_space<smem>>
    %374 = vector.broadcast %373 : f32 to vector<1x256xf32>
    %375 = arith.mulf %374, %83 : vector<1x256xf32>
    %376 = arith.addf %368, %375 : vector<1x256xf32>
    %c73 = arith.constant 73 : index
    %377 = memref.load %arg8[%c73] : memref<98xf32, #tpu.memory_space<smem>>
    %378 = vector.broadcast %377 : f32 to vector<1x256xf32>
    %379 = arith.mulf %378, %42 : vector<1x256xf32>
    %380 = arith.addf %372, %379 : vector<1x256xf32>
    %c74 = arith.constant 74 : index
    %381 = memref.load %arg8[%c74] : memref<98xf32, #tpu.memory_space<smem>>
    %382 = vector.broadcast %381 : f32 to vector<1x256xf32>
    %383 = arith.mulf %382, %96 : vector<1x256xf32>
    %384 = arith.addf %376, %383 : vector<1x256xf32>
    %c75 = arith.constant 75 : index
    %385 = memref.load %arg8[%c75] : memref<98xf32, #tpu.memory_space<smem>>
    %386 = vector.broadcast %385 : f32 to vector<1x256xf32>
    %387 = arith.mulf %386, %109 : vector<1x256xf32>
    %388 = arith.addf %380, %387 : vector<1x256xf32>
    %c76 = arith.constant 76 : index
    %389 = memref.load %arg8[%c76] : memref<98xf32, #tpu.memory_space<smem>>
    %390 = vector.broadcast %389 : f32 to vector<1x256xf32>
    %391 = arith.mulf %390, %122 : vector<1x256xf32>
    %392 = arith.addf %384, %391 : vector<1x256xf32>
    %393 = arith.addf %392, %388 : vector<1x256xf32>
    %394 = arith.addf %264, %393 : vector<1x256xf32>
    %cst_83 = arith.constant 0.000000e+00 : f32
    %395 = vector.broadcast %cst_83 : f32 to vector<1x256xf32>
    %cst_84 = arith.constant 0.000000e+00 : f32
    %396 = vector.broadcast %cst_84 : f32 to vector<1x256xf32>
    %c28 = arith.constant 28 : index
    %397 = memref.load %arg8[%c28] : memref<98xf32, #tpu.memory_space<smem>>
    %398 = vector.broadcast %397 : f32 to vector<1x256xf32>
    %399 = arith.mulf %398, %54 : vector<1x256xf32>
    %400 = arith.addf %395, %399 : vector<1x256xf32>
    %c29 = arith.constant 29 : index
    %401 = memref.load %arg8[%c29] : memref<98xf32, #tpu.memory_space<smem>>
    %402 = vector.broadcast %401 : f32 to vector<1x256xf32>
    %403 = arith.mulf %402, %67 : vector<1x256xf32>
    %404 = arith.addf %396, %403 : vector<1x256xf32>
    %c30 = arith.constant 30 : index
    %405 = memref.load %arg8[%c30] : memref<98xf32, #tpu.memory_space<smem>>
    %406 = vector.broadcast %405 : f32 to vector<1x256xf32>
    %407 = arith.mulf %406, %80 : vector<1x256xf32>
    %408 = arith.addf %400, %407 : vector<1x256xf32>
    %c31 = arith.constant 31 : index
    %409 = memref.load %arg8[%c31] : memref<98xf32, #tpu.memory_space<smem>>
    %410 = vector.broadcast %409 : f32 to vector<1x256xf32>
    %411 = arith.mulf %410, %40 : vector<1x256xf32>
    %412 = arith.addf %404, %411 : vector<1x256xf32>
    %c32 = arith.constant 32 : index
    %413 = memref.load %arg8[%c32] : memref<98xf32, #tpu.memory_space<smem>>
    %414 = vector.broadcast %413 : f32 to vector<1x256xf32>
    %415 = arith.mulf %414, %93 : vector<1x256xf32>
    %416 = arith.addf %408, %415 : vector<1x256xf32>
    %c33 = arith.constant 33 : index
    %417 = memref.load %arg8[%c33] : memref<98xf32, #tpu.memory_space<smem>>
    %418 = vector.broadcast %417 : f32 to vector<1x256xf32>
    %419 = arith.mulf %418, %106 : vector<1x256xf32>
    %420 = arith.addf %412, %419 : vector<1x256xf32>
    %c34 = arith.constant 34 : index
    %421 = memref.load %arg8[%c34] : memref<98xf32, #tpu.memory_space<smem>>
    %422 = vector.broadcast %421 : f32 to vector<1x256xf32>
    %423 = arith.mulf %422, %119 : vector<1x256xf32>
    %424 = arith.addf %416, %423 : vector<1x256xf32>
    %c77 = arith.constant 77 : index
    %425 = memref.load %arg8[%c77] : memref<98xf32, #tpu.memory_space<smem>>
    %426 = vector.broadcast %425 : f32 to vector<1x256xf32>
    %427 = arith.mulf %426, %57 : vector<1x256xf32>
    %428 = arith.addf %424, %427 : vector<1x256xf32>
    %c78 = arith.constant 78 : index
    %429 = memref.load %arg8[%c78] : memref<98xf32, #tpu.memory_space<smem>>
    %430 = vector.broadcast %429 : f32 to vector<1x256xf32>
    %431 = arith.mulf %430, %70 : vector<1x256xf32>
    %432 = arith.addf %420, %431 : vector<1x256xf32>
    %c79 = arith.constant 79 : index
    %433 = memref.load %arg8[%c79] : memref<98xf32, #tpu.memory_space<smem>>
    %434 = vector.broadcast %433 : f32 to vector<1x256xf32>
    %435 = arith.mulf %434, %83 : vector<1x256xf32>
    %436 = arith.addf %428, %435 : vector<1x256xf32>
    %c80 = arith.constant 80 : index
    %437 = memref.load %arg8[%c80] : memref<98xf32, #tpu.memory_space<smem>>
    %438 = vector.broadcast %437 : f32 to vector<1x256xf32>
    %439 = arith.mulf %438, %42 : vector<1x256xf32>
    %440 = arith.addf %432, %439 : vector<1x256xf32>
    %c81 = arith.constant 81 : index
    %441 = memref.load %arg8[%c81] : memref<98xf32, #tpu.memory_space<smem>>
    %442 = vector.broadcast %441 : f32 to vector<1x256xf32>
    %443 = arith.mulf %442, %96 : vector<1x256xf32>
    %444 = arith.addf %436, %443 : vector<1x256xf32>
    %c82 = arith.constant 82 : index
    %445 = memref.load %arg8[%c82] : memref<98xf32, #tpu.memory_space<smem>>
    %446 = vector.broadcast %445 : f32 to vector<1x256xf32>
    %447 = arith.mulf %446, %109 : vector<1x256xf32>
    %448 = arith.addf %440, %447 : vector<1x256xf32>
    %c83 = arith.constant 83 : index
    %449 = memref.load %arg8[%c83] : memref<98xf32, #tpu.memory_space<smem>>
    %450 = vector.broadcast %449 : f32 to vector<1x256xf32>
    %451 = arith.mulf %450, %122 : vector<1x256xf32>
    %452 = arith.addf %444, %451 : vector<1x256xf32>
    %453 = arith.addf %452, %448 : vector<1x256xf32>
    %c240_i32 = arith.constant 240 : i32
    %454 = tpu.dynamic_rotate %453 by %c240_i32 dim 1 : vector<1x256xf32>, i32 -> vector<1x256xf32>
    %c1_i32_85 = arith.constant 1 : i32
    %455 = vector.broadcast %c1_i32_85 : i32 to vector<1x256xi32>
    %456 = arith.addi %44, %455 : vector<1x256xi32>
    %c0_i32_86 = arith.constant 0 : i32
    %457 = vector.broadcast %c0_i32_86 : i32 to vector<1x256xi32>
    %458 = arith.cmpi sge, %456, %457 : vector<1x256xi32>
    %c16_i32_87 = arith.constant 16 : i32
    %459 = vector.broadcast %c16_i32_87 : i32 to vector<1x256xi32>
    %460 = arith.cmpi slt, %456, %459 : vector<1x256xi32>
    %461 = arith.andi %458, %460 : vector<1x256xi1>
    %cst_88 = arith.constant 0.000000e+00 : f32
    %462 = vector.broadcast %cst_88 : f32 to vector<1x256xf32>
    %463 = arith.select %461, %454, %462 : vector<1x256xi1>, vector<1x256xf32>
    %464 = arith.addf %334, %463 : vector<1x256xf32>
    %cst_89 = arith.constant 0.000000e+00 : f32
    %465 = vector.broadcast %cst_89 : f32 to vector<1x256xf32>
    %cst_90 = arith.constant 0.000000e+00 : f32
    %466 = vector.broadcast %cst_90 : f32 to vector<1x256xf32>
    %c35 = arith.constant 35 : index
    %467 = memref.load %arg8[%c35] : memref<98xf32, #tpu.memory_space<smem>>
    %468 = vector.broadcast %467 : f32 to vector<1x256xf32>
    %469 = arith.mulf %468, %54 : vector<1x256xf32>
    %470 = arith.addf %465, %469 : vector<1x256xf32>
    %c36 = arith.constant 36 : index
    %471 = memref.load %arg8[%c36] : memref<98xf32, #tpu.memory_space<smem>>
    %472 = vector.broadcast %471 : f32 to vector<1x256xf32>
    %473 = arith.mulf %472, %67 : vector<1x256xf32>
    %474 = arith.addf %466, %473 : vector<1x256xf32>
    %c37 = arith.constant 37 : index
    %475 = memref.load %arg8[%c37] : memref<98xf32, #tpu.memory_space<smem>>
    %476 = vector.broadcast %475 : f32 to vector<1x256xf32>
    %477 = arith.mulf %476, %80 : vector<1x256xf32>
    %478 = arith.addf %470, %477 : vector<1x256xf32>
    %c38 = arith.constant 38 : index
    %479 = memref.load %arg8[%c38] : memref<98xf32, #tpu.memory_space<smem>>
    %480 = vector.broadcast %479 : f32 to vector<1x256xf32>
    %481 = arith.mulf %480, %40 : vector<1x256xf32>
    %482 = arith.addf %474, %481 : vector<1x256xf32>
    %c39 = arith.constant 39 : index
    %483 = memref.load %arg8[%c39] : memref<98xf32, #tpu.memory_space<smem>>
    %484 = vector.broadcast %483 : f32 to vector<1x256xf32>
    %485 = arith.mulf %484, %93 : vector<1x256xf32>
    %486 = arith.addf %478, %485 : vector<1x256xf32>
    %c40 = arith.constant 40 : index
    %487 = memref.load %arg8[%c40] : memref<98xf32, #tpu.memory_space<smem>>
    %488 = vector.broadcast %487 : f32 to vector<1x256xf32>
    %489 = arith.mulf %488, %106 : vector<1x256xf32>
    %490 = arith.addf %482, %489 : vector<1x256xf32>
    %c41 = arith.constant 41 : index
    %491 = memref.load %arg8[%c41] : memref<98xf32, #tpu.memory_space<smem>>
    %492 = vector.broadcast %491 : f32 to vector<1x256xf32>
    %493 = arith.mulf %492, %119 : vector<1x256xf32>
    %494 = arith.addf %486, %493 : vector<1x256xf32>
    %c84 = arith.constant 84 : index
    %495 = memref.load %arg8[%c84] : memref<98xf32, #tpu.memory_space<smem>>
    %496 = vector.broadcast %495 : f32 to vector<1x256xf32>
    %497 = arith.mulf %496, %57 : vector<1x256xf32>
    %498 = arith.addf %494, %497 : vector<1x256xf32>
    %c85 = arith.constant 85 : index
    %499 = memref.load %arg8[%c85] : memref<98xf32, #tpu.memory_space<smem>>
    %500 = vector.broadcast %499 : f32 to vector<1x256xf32>
    %501 = arith.mulf %500, %70 : vector<1x256xf32>
    %502 = arith.addf %490, %501 : vector<1x256xf32>
    %c86 = arith.constant 86 : index
    %503 = memref.load %arg8[%c86] : memref<98xf32, #tpu.memory_space<smem>>
    %504 = vector.broadcast %503 : f32 to vector<1x256xf32>
    %505 = arith.mulf %504, %83 : vector<1x256xf32>
    %506 = arith.addf %498, %505 : vector<1x256xf32>
    %c87 = arith.constant 87 : index
    %507 = memref.load %arg8[%c87] : memref<98xf32, #tpu.memory_space<smem>>
    %508 = vector.broadcast %507 : f32 to vector<1x256xf32>
    %509 = arith.mulf %508, %42 : vector<1x256xf32>
    %510 = arith.addf %502, %509 : vector<1x256xf32>
    %c88 = arith.constant 88 : index
    %511 = memref.load %arg8[%c88] : memref<98xf32, #tpu.memory_space<smem>>
    %512 = vector.broadcast %511 : f32 to vector<1x256xf32>
    %513 = arith.mulf %512, %96 : vector<1x256xf32>
    %514 = arith.addf %506, %513 : vector<1x256xf32>
    %c89 = arith.constant 89 : index
    %515 = memref.load %arg8[%c89] : memref<98xf32, #tpu.memory_space<smem>>
    %516 = vector.broadcast %515 : f32 to vector<1x256xf32>
    %517 = arith.mulf %516, %109 : vector<1x256xf32>
    %518 = arith.addf %510, %517 : vector<1x256xf32>
    %c90 = arith.constant 90 : index
    %519 = memref.load %arg8[%c90] : memref<98xf32, #tpu.memory_space<smem>>
    %520 = vector.broadcast %519 : f32 to vector<1x256xf32>
    %521 = arith.mulf %520, %122 : vector<1x256xf32>
    %522 = arith.addf %514, %521 : vector<1x256xf32>
    %523 = arith.addf %522, %518 : vector<1x256xf32>
    %c224_i32 = arith.constant 224 : i32
    %524 = tpu.dynamic_rotate %523 by %c224_i32 dim 1 : vector<1x256xf32>, i32 -> vector<1x256xf32>
    %c2_i32_91 = arith.constant 2 : i32
    %525 = vector.broadcast %c2_i32_91 : i32 to vector<1x256xi32>
    %526 = arith.addi %44, %525 : vector<1x256xi32>
    %c0_i32_92 = arith.constant 0 : i32
    %527 = vector.broadcast %c0_i32_92 : i32 to vector<1x256xi32>
    %528 = arith.cmpi sge, %526, %527 : vector<1x256xi32>
    %c16_i32_93 = arith.constant 16 : i32
    %529 = vector.broadcast %c16_i32_93 : i32 to vector<1x256xi32>
    %530 = arith.cmpi slt, %526, %529 : vector<1x256xi32>
    %531 = arith.andi %528, %530 : vector<1x256xi1>
    %cst_94 = arith.constant 0.000000e+00 : f32
    %532 = vector.broadcast %cst_94 : f32 to vector<1x256xf32>
    %533 = arith.select %531, %524, %532 : vector<1x256xi1>, vector<1x256xf32>
    %534 = arith.addf %394, %533 : vector<1x256xf32>
    %cst_95 = arith.constant 0.000000e+00 : f32
    %535 = vector.broadcast %cst_95 : f32 to vector<1x256xf32>
    %cst_96 = arith.constant 0.000000e+00 : f32
    %536 = vector.broadcast %cst_96 : f32 to vector<1x256xf32>
    %c42 = arith.constant 42 : index
    %537 = memref.load %arg8[%c42] : memref<98xf32, #tpu.memory_space<smem>>
    %538 = vector.broadcast %537 : f32 to vector<1x256xf32>
    %539 = arith.mulf %538, %54 : vector<1x256xf32>
    %540 = arith.addf %535, %539 : vector<1x256xf32>
    %c43 = arith.constant 43 : index
    %541 = memref.load %arg8[%c43] : memref<98xf32, #tpu.memory_space<smem>>
    %542 = vector.broadcast %541 : f32 to vector<1x256xf32>
    %543 = arith.mulf %542, %67 : vector<1x256xf32>
    %544 = arith.addf %536, %543 : vector<1x256xf32>
    %c44 = arith.constant 44 : index
    %545 = memref.load %arg8[%c44] : memref<98xf32, #tpu.memory_space<smem>>
    %546 = vector.broadcast %545 : f32 to vector<1x256xf32>
    %547 = arith.mulf %546, %80 : vector<1x256xf32>
    %548 = arith.addf %540, %547 : vector<1x256xf32>
    %c45 = arith.constant 45 : index
    %549 = memref.load %arg8[%c45] : memref<98xf32, #tpu.memory_space<smem>>
    %550 = vector.broadcast %549 : f32 to vector<1x256xf32>
    %551 = arith.mulf %550, %40 : vector<1x256xf32>
    %552 = arith.addf %544, %551 : vector<1x256xf32>
    %c46 = arith.constant 46 : index
    %553 = memref.load %arg8[%c46] : memref<98xf32, #tpu.memory_space<smem>>
    %554 = vector.broadcast %553 : f32 to vector<1x256xf32>
    %555 = arith.mulf %554, %93 : vector<1x256xf32>
    %556 = arith.addf %548, %555 : vector<1x256xf32>
    %c47 = arith.constant 47 : index
    %557 = memref.load %arg8[%c47] : memref<98xf32, #tpu.memory_space<smem>>
    %558 = vector.broadcast %557 : f32 to vector<1x256xf32>
    %559 = arith.mulf %558, %106 : vector<1x256xf32>
    %560 = arith.addf %552, %559 : vector<1x256xf32>
    %c48 = arith.constant 48 : index
    %561 = memref.load %arg8[%c48] : memref<98xf32, #tpu.memory_space<smem>>
    %562 = vector.broadcast %561 : f32 to vector<1x256xf32>
    %563 = arith.mulf %562, %119 : vector<1x256xf32>
    %564 = arith.addf %556, %563 : vector<1x256xf32>
    %c91 = arith.constant 91 : index
    %565 = memref.load %arg8[%c91] : memref<98xf32, #tpu.memory_space<smem>>
    %566 = vector.broadcast %565 : f32 to vector<1x256xf32>
    %567 = arith.mulf %566, %57 : vector<1x256xf32>
    %568 = arith.addf %564, %567 : vector<1x256xf32>
    %c92 = arith.constant 92 : index
    %569 = memref.load %arg8[%c92] : memref<98xf32, #tpu.memory_space<smem>>
    %570 = vector.broadcast %569 : f32 to vector<1x256xf32>
    %571 = arith.mulf %570, %70 : vector<1x256xf32>
    %572 = arith.addf %560, %571 : vector<1x256xf32>
    %c93 = arith.constant 93 : index
    %573 = memref.load %arg8[%c93] : memref<98xf32, #tpu.memory_space<smem>>
    %574 = vector.broadcast %573 : f32 to vector<1x256xf32>
    %575 = arith.mulf %574, %83 : vector<1x256xf32>
    %576 = arith.addf %568, %575 : vector<1x256xf32>
    %c94 = arith.constant 94 : index
    %577 = memref.load %arg8[%c94] : memref<98xf32, #tpu.memory_space<smem>>
    %578 = vector.broadcast %577 : f32 to vector<1x256xf32>
    %579 = arith.mulf %578, %42 : vector<1x256xf32>
    %580 = arith.addf %572, %579 : vector<1x256xf32>
    %c95 = arith.constant 95 : index
    %581 = memref.load %arg8[%c95] : memref<98xf32, #tpu.memory_space<smem>>
    %582 = vector.broadcast %581 : f32 to vector<1x256xf32>
    %583 = arith.mulf %582, %96 : vector<1x256xf32>
    %584 = arith.addf %576, %583 : vector<1x256xf32>
    %c96 = arith.constant 96 : index
    %585 = memref.load %arg8[%c96] : memref<98xf32, #tpu.memory_space<smem>>
    %586 = vector.broadcast %585 : f32 to vector<1x256xf32>
    %587 = arith.mulf %586, %109 : vector<1x256xf32>
    %588 = arith.addf %580, %587 : vector<1x256xf32>
    %c97 = arith.constant 97 : index
    %589 = memref.load %arg8[%c97] : memref<98xf32, #tpu.memory_space<smem>>
    %590 = vector.broadcast %589 : f32 to vector<1x256xf32>
    %591 = arith.mulf %590, %122 : vector<1x256xf32>
    %592 = arith.addf %584, %591 : vector<1x256xf32>
    %593 = arith.addf %592, %588 : vector<1x256xf32>
    %c208_i32 = arith.constant 208 : i32
    %594 = tpu.dynamic_rotate %593 by %c208_i32 dim 1 : vector<1x256xf32>, i32 -> vector<1x256xf32>
    %c3_i32_97 = arith.constant 3 : i32
    %595 = vector.broadcast %c3_i32_97 : i32 to vector<1x256xi32>
    %596 = arith.addi %44, %595 : vector<1x256xi32>
    %c0_i32_98 = arith.constant 0 : i32
    %597 = vector.broadcast %c0_i32_98 : i32 to vector<1x256xi32>
    %598 = arith.cmpi sge, %596, %597 : vector<1x256xi32>
    %c16_i32_99 = arith.constant 16 : i32
    %599 = vector.broadcast %c16_i32_99 : i32 to vector<1x256xi32>
    %600 = arith.cmpi slt, %596, %599 : vector<1x256xi32>
    %601 = arith.andi %598, %600 : vector<1x256xi1>
    %cst_100 = arith.constant 0.000000e+00 : f32
    %602 = vector.broadcast %cst_100 : f32 to vector<1x256xf32>
    %603 = arith.select %601, %594, %602 : vector<1x256xi1>, vector<1x256xf32>
    %604 = arith.addf %464, %603 : vector<1x256xf32>
    %605 = arith.addf %604, %534 : vector<1x256xf32>
    %c0_101 = arith.constant 0 : index
    %606 = memref.load %arg9[%c0_101] : memref<4xf32, #tpu.memory_space<smem>>
    %c1_102 = arith.constant 1 : index
    %607 = memref.load %arg9[%c1_102] : memref<4xf32, #tpu.memory_space<smem>>
    %c2_103 = arith.constant 2 : index
    %608 = memref.load %arg9[%c2_103] : memref<4xf32, #tpu.memory_space<smem>>
    %c3_104 = arith.constant 3 : index
    %609 = memref.load %arg9[%c3_104] : memref<4xf32, #tpu.memory_space<smem>>
    %610 = vector.broadcast %608 : f32 to vector<1x256xf32>
    %611 = arith.subf %605, %610 : vector<1x256xf32>
    %cst_105 = arith.constant 9.99999974E-6 : f32
    %612 = arith.addf %609, %cst_105 : f32
    %613 = math.sqrt %612 : f32
    %614 = arith.divf %606, %613 : f32
    %615 = vector.broadcast %614 : f32 to vector<1x256xf32>
    %616 = arith.mulf %611, %615 : vector<1x256xf32>
    %617 = vector.broadcast %607 : f32 to vector<1x256xf32>
    %618 = arith.addf %616, %617 : vector<1x256xf32>
    %cst_106 = arith.constant 0.000000e+00 : f32
    %619 = vector.broadcast %cst_106 : f32 to vector<1x256xf32>
    %620 = arith.subf %619, %618 : vector<1x256xf32>
    %621 = math.exp %620 : vector<1x256xf32>
    %cst_107 = arith.constant 1.000000e+00 : f32
    %622 = vector.broadcast %cst_107 : f32 to vector<1x256xf32>
    %623 = arith.addf %622, %621 : vector<1x256xf32>
    %cst_108 = arith.constant 1.000000e+00 : f32
    %624 = vector.broadcast %cst_108 : f32 to vector<1x256xf32>
    %625 = arith.divf %624, %623 : vector<1x256xf32>
    %626 = vector.broadcast %625 : vector<1x256xf32> to vector<32x256xf32>
    %627 = arith.mulf %38, %626 : vector<32x256xf32>
    %c0_109 = arith.constant 0 : index
    %c0_110 = arith.constant 0 : index
    %c0_111 = arith.constant 0 : index
    %628 = vector.load %arg10[%c0_109, %c0_110, %c0_111] : memref<1x32x256xf32, #tpu.memory_space<vmem>>, vector<1x32x256xf32>
    %629 = vector.shape_cast %628 : vector<1x32x256xf32> to vector<32x256xf32>
    %630 = vector.shape_cast %627 : vector<32x256xf32> to vector<1x32x256xf32>
    tpu.vector_store %arg10[%c0_109, %c0_110, %c0_111], %630 {strides = array<i32>} : memref<1x32x256xf32, #tpu.memory_space<vmem>>, vector<1x32x256xf32>,
    return
  }
  func.func @transform_0(%arg0: i32) -> (i32, i32, i32) {
    %c0_i32 = arith.constant 0 : i32
    %c0_i32_0 = arith.constant 0 : i32
    %c0_i32_1 = arith.constant 0 : i32
    return %arg0, %c0_i32, %c0_i32_0 : i32, i32, i32
  }
  func.func @transform_1(%arg0: i32) -> (i32, i32) {
    %c0_i32 = arith.constant 0 : i32
    %c0_i32_0 = arith.constant 0 : i32
    %c0_i32_1 = arith.constant 0 : i32
    return %c0_i32, %c0_i32_0 : i32, i32
  }
  func.func @transform_2(%arg0: i32) -> (i32, i32) {
    %c0_i32 = arith.constant 0 : i32
    %c0_i32_0 = arith.constant 0 : i32
    %c0_i32_1 = arith.constant 0 : i32
    return %c0_i32, %c0_i32_0 : i32, i32
  }
  func.func @transform_3(%arg0: i32) -> (i32, i32) {
    %c0_i32 = arith.constant 0 : i32
    %c0_i32_0 = arith.constant 0 : i32
    %c0_i32_1 = arith.constant 0 : i32
    return %c0_i32, %c0_i32_0 : i32, i32
  }
  func.func @transform_4(%arg0: i32) -> (i32, i32) {
    %c0_i32 = arith.constant 0 : i32
    %c0_i32_0 = arith.constant 0 : i32
    %c0_i32_1 = arith.constant 0 : i32
    return %c0_i32, %c0_i32_0 : i32, i32
  }
  func.func @transform_5(%arg0: i32) -> (i32, i32) {
    %c0_i32 = arith.constant 0 : i32
    %c0_i32_0 = arith.constant 0 : i32
    %c0_i32_1 = arith.constant 0 : i32
    return %c0_i32, %c0_i32_0 : i32, i32
  }
  func.func @transform_6(%arg0: i32) -> (i32, i32) {
    %c0_i32 = arith.constant 0 : i32
    %c0_i32_0 = arith.constant 0 : i32
    %c0_i32_1 = arith.constant 0 : i32
    return %c0_i32, %c0_i32_0 : i32, i32
  }
  func.func @transform_7(%arg0: i32) -> i32 {
    %c0_i32 = arith.constant 0 : i32
    %c0_i32_0 = arith.constant 0 : i32
    return %c0_i32 : i32
  }
  func.func @transform_8(%arg0: i32) -> i32 {
    %c0_i32 = arith.constant 0 : i32
    %c0_i32_0 = arith.constant 0 : i32
    return %c0_i32 : i32
  }
  func.func @transform_9(%arg0: i32) -> (i32, i32, i32) {
    %c0_i32 = arith.constant 0 : i32
    %c0_i32_0 = arith.constant 0 : i32
    %c0_i32_1 = arith.constant 0 : i32
    return %arg0, %c0_i32, %c0_i32_0 : i32, i32, i32
  }
}

</mosaic_0001>

<bundles_post_ra>
// kernel: tpu_custom_call.1
= control target key start
LH: loop header
LB: loop body
LE: loop exit
PB: predicated region body
PF: predicated region fallthrough
CT: control target
= control target key end

     0   :  { %s3336_s0 = inlined_call_operand.hbm [shape: f32[2,32,256], index: 0, kind: input, shape index: {}]   ;;  %s3337_s1 = inlined_call_operand.vmem [shape: f32[2,32], index: 1, kind: input, shape index: {}]   ;;  %s3338_s2 = inlined_call_operand.vmem [shape: f32[2,1], index: 2, kind: input, shape index: {}]   ;;  %s3339_s3 = inlined_call_operand.vmem [shape: f32[32,2], index: 3, kind: input, shape index: {}]   ;;  %s3340_s4 = inlined_call_operand.vmem [shape: f32[32,1], index: 4, kind: input, shape index: {}]   ;;  %s3341_s5 = inlined_call_operand.vmem [shape: s32[1,256], index: 5, kind: input, shape index: {}]   ;;  %s3342_s6 = inlined_call_operand.vmem [shape: s32[1,256], index: 6, kind: input, shape index: {}]   ;;  %s3343_s7 = inlined_call_operand.vmem [shape: f32[98], index: 7, kind: input, shape index: {}]   ;;  %s3344_s8 = inlined_call_operand.vmem [shape: f32[4], index: 8, kind: input, shape index: {}]   ;;  %s3345_s9 = inlined_call_operand.hbm [shape: f32[2,32,256], index: 9, kind: output, shape index: {}]  }
   0x1   :  { %3370 = sst [smem:[#allocation38_spill]] %s3336_s0 }
   0x2   :  { %3371 = sst [smem:[#allocation39_spill]] %s3337_s1 }
   0x3   :  { %3372 = sst [smem:[#allocation40_spill]] %s3338_s2 }
   0x4   :  { %3373 = sst [smem:[#allocation41_spill]] %s3339_s3 }
   0x5   :  { %3374 = sst [smem:[#allocation42_spill]] %s3340_s4 }
   0x6   :  { %3375 = sst [smem:[#allocation43_spill]] %s3341_s5 }
   0x7   :  { %3376 = sst [smem:[#allocation44_spill]] %s3342_s6 }
   0x8   :  { %3377 = sst [smem:[#allocation45_spill]] %s3343_s7 }
   0x9   :  { %3378 = sst [smem:[#allocation46_spill]] %s3344_s8 }
   0xa   :  { %3379 = sst [smem:[#allocation47_spill]] %s3345_s9 }
   0xb   :  { %14 = vsyncpa [#allocation3], 0 }
   0xc   :  { %16 = vsyncpa [#allocation3 + $0x1], 0 }
   0xd   :  { %17 = vsyncpa [#allocation5], 0 }
   0xe   :  { %18 = vsyncpa [#allocation8], 0 }
   0xf   :  { %19 = vsyncpa [#allocation4], 0 }
  0x10   :  { %21 = vsyncpa [#allocation4 + $0x1], 0  ;;  %s2205_s30 = smov 0   ;;  %s2207_s10 = smov 0  }
  0x11   :  { %s2209_s11 = smov 0   ;;  %s2211_s12 = smov 0  }
  0x12 LB: > { %3380 = sst [smem:[#allocation14_spill]] %s2121_s30  ;;  %s2226_s13 = sadd.s32 4294967295, %s2133_s12   ;;  %s2133_s12 = sphi %s2211_s12, %s3471_s12   ;;  %s2129_s11 = sphi %s2209_s11, %s3474_s11   ;;  %s2125_s10 = sphi %s2207_s10, %s3473_s10   ;;  %s2121_s30 = sphi %s2205_s30, %s3472_s30  }
  0x13   : > { %3381 = sst [smem:[#allocation15_spill]] %s2125_s10  ;;  %s1745_s14 = sadd.s32 4294967294, %s2133_s12  }
  0x14   : > { %3382 = sst [smem:[#allocation16_spill]] %s2129_s11  ;;  %s2230_s15 = sadd.s32 1, %s2133_s12  }
  0x15   : > { %3383 = sst [smem:[#allocation17_spill]] %s2133_s12  ;;  %s34_s16 = sadd.s32 1, %s2129_s11 }
  0x16   : > { %3384 = sst [smem:[#allocation18_spill]] %s2226_s13  ;;  %s31_s17 = ssub.s32 %s2133_s12, %s2230_s15 }
  0x17   : > { %3385 = sst [smem:[#allocation19_spill]] %s2230_s15  ;;  %p41_p0 = scmp.ne.s32.totalorder %s2129_s11, %s2125_s10 }
  0x18   : > { %p32_p1 = scmp.eq.s32.totalorder %s31_s17, 0  ;;  %p42_p2 = scmp.eq.s32.totalorder %s2133_s12, 0 }
  0x19   : > { %p47_p3 = scmp.ne.s32.totalorder %s2125_s10, %s2121_s30  ;;  %p48_p4 = scmp.eq.s32.totalorder %s2226_s13, 0 }
  0x1a   : > { %s2242_s18 = scalar_select %p32_p1, %s2129_s11, %s34_s16  }
  0x1b   : > { %p2244_p5 = por %p42_p2, %p41_p0  ;;  %p2250_p6 = por %p48_p4, %p47_p3 }
  0x1c   : > { %3386 = sst [smem:[#allocation20_spill]] %s2242_s18  ;;  %p239_p7 = scmp.eq.s32.totalorder %s2226_s13, 1 }
  0x1d   : > { %p245_p8 = scmp.eq.s32.totalorder %s1745_s14, 1  ;;  %p1746_p9 = scmp.ge.s32.totalorder %s2133_s12, 1 }
  0x1e   : > { %p252_p10 = scmp.lt.s32.totalorder %s2133_s12, 3  ;;  %p2257_p11 = por %p239_p7, %p41_p0 }
  0x1f   : > { %p2261_p12 = por %p245_p8, %p47_p3  ;;  %s3394_s7 = sld [smem:[#allocation45_spill]] }
  0x20   : > { %s3389_s21 = scalar_select %p2257_p11, 1, 0 }
  0x21   : > { %s3391_s22 = scalar_select %p2261_p12, 1, 0 }
  0x22   : > { %3390 = sst [smem:[#allocation21_spill]] %s3389_s21  ;;  %p2265_p13 = pnand %p1746_p9, %p252_p10 }
  0x23   : > { %3392 = sst [smem:[#allocation22_spill]] %s3391_s22  ;;  %p1906_p2 = scmp.lt.s32.totalorder %s2133_s12, 2 }
  0x24   : > { %p1889_p1 = pneg %p2265_p13  ;;  %s3395_s8 = sld [smem:[#allocation46_spill]] }
  0x25   : > { %s282_s26 = sshll.u32 %s3394_s7, 4  ;;  %p2283_p7 = pnand %p1906_p2, %p2244_p5  ;;  %s283_s26 = int_to_ptr.vmem [resolvable:$true] %s282_s26 }
  0x26   : > { %p1890_p3 = pnand %p1889_p1, %p48_p4  ;;  %s2135_s16 = smov [#allocation6]  }
  0x27   : > { %s303_s17 = sand.u32 1, %s2129_s11   ;;  %s2136_s24 = smov [#allocation7]  }
  0x28   : > { %1892 = dma.vmem_to_smem (!%p1890_p3), %s283_s26, 16, %s2135_s16, [#allocation5]  }
  0x29   : > { %s1750_s25 = sshll.u32 %s303_s17, 6  ;;  %s1871_s7 = sshll.u32 %s2133_s12, 6 }
  0x2a   : > { %s292_s29 = sshll.u32 %s3395_s8, 4  ;;  %s3397_s0 = sld [smem:[#allocation38_spill]]  ;;  %s293_s29 = int_to_ptr.vmem [resolvable:$true] %s292_s29 }
  0x2b   : > { %1895 = dma.vmem_to_smem (!%p1890_p3), %s293_s29, 16, %s2136_s24, [#allocation8]  }
  0x2c   : > { %s307_s27 = scalar_lea.vmem [#allocation2], %s1750_s25  ;;  %s304_s8 = scalar_lea.sflag [#allocation3], %s303_s17 }
  0x2d   : > { %s315_s28 = sshll.u32 %s307_s27, 4  ;;  %p2033_p8 = pneg %p2283_p7  ;;  %s316_s28 = int_to_ptr.vmem [resolvable:$true] %s315_s28 }
  0x30   : > { %s312_s22 = scalar_lea.hbm %s3397_s0, %s1871_s7  ;;  %s2036_s16 = scalar_lea.hbm %s3397_s0, 128 }
  0x31   : > { %s313_s19 = sshll.u32 %s312_s22, 4  ;;  %s314_s19 = int_to_ptr.hbm [resolvable:$true] %s313_s19 }
  0x32   : > { %s2029_s30 = sshra.s32 %s314_s19, 4  ;;  %s2030_s30 = int_to_ptr.hbm [resolvable:$true] %s2029_s30 }
  0x33   : > { %s2031_s21 = scalar_lea.hbm %s2030_s30, 64  ;;  %p2037_p1 = scmp.lt.s32.totalorder %s2030_s30, %s3397_s0 }
  0x34   : > { %p2032_p5 = scmp.ne.s32.totalorder %s2030_s30, %s2031_s21  ;;  %p2038_p2 = scmp.lt.s32.totalorder %s2036_s16, %s2031_s21 }
  0x36   : > { %p2034_p9 = pnand %p2033_p8, %p2032_p5  ;;  %p2039_p3 = por %p2038_p2, %p2037_p1 }
  0x38   : > { %p2035_p10 = pneg %p2034_p9 }
  0x3a   : > { %p2040_p0 = pnand %p2039_p3, %p2035_p10 }
  0x3c   : > { %2043 = shalt.err (!%p2040_p0)
}
  0x3d   : > { %s2137_s18 = smov 256   ;;  %s2138_s22 = smov 16  }
  0x3e   : > { %1899 = dma.hbm_to_vmem [thread:$0]  (!%p2283_p7), %s314_s19, 1024, %s316_s28, %s304_s8, %s2137_s18, %s2137_s18, %s2138_s22  }
  0x3f   : > { %327 = sbr.rel (%p2265_p13) target bundleno = 1355 (0x54b), region = 56 }
  0x44   : > { %s2305_s17 = sand.u32 1, %s2125_s10  }
  0x45   : > { %3398 = sst [smem:[#allocation23_spill]] %s2305_s17  ;;  %s3352_s30 = sshll.u32 %s2305_s17, 6 }
  0x46   : > { %s330_s21 = scalar_lea.sflag [#allocation3], %s2305_s17  ;;  %s2311_s24 = scalar_lea.vmem [#allocation2], %s3352_s30 }
  0x47   : > { %2104 = dma.done.wait (%p2250_p6), %s330_s21, 1024  }
  0x48   : > { %2106 = vsyncadd (%p2250_p6), %s330_s21, 4294966272 }
  0x49   : > { %2108 = dma.done.wait (%p48_p4), [#allocation5], 16  }
  0x4a   : > { %2110 = vsyncadd (%p48_p4), [#allocation5], 4294967280 }
  0x4b   : > { %2112 = dma.done.wait (%p48_p4), [#allocation8], 16  }
  0x4c   : > { %2114 = vsyncadd (%p48_p4), [#allocation8], 4294967280 }
  0x4d   : > { %349 = sfence }
  0x4e   : > { %v2139_v0 = vmov 1.0   ;;  %v2326_v1 = vld [vmem:[%s2311_s24 + $0x20] sm:$0xff]  ;;  %v2329_v2 = vld [vmem:[%s2311_s24 + $0x28] sm:$0xff]  ;;  %v2340_v6 = vld [vmem:[%s2311_s24 + $0x10] sm:$0xff]  ;;  %v2140_v12 = vmov 0   ;;  %s3399_s4 = sld [smem:[#allocation42_spill]]  ;;  %v462_v36 = vlaneseq }
  0x4f   : > { %388 = vmatpush.msra.mxu0 %v2139_v0  ;;  %417 = vmatpush.msra.mxu1 %v2139_v0  ;;  %v456_v3 = vmax.f32 %v2326_v1, %v2329_v2  ;;  %v2334_v4 = vld [vmem:[%s2311_s24] sm:$0xff]  ;;  %v2337_v5 = vld [vmem:[%s2311_s24 + $0x8] sm:$0xff]  ;;  %v2343_v7 = vld [vmem:[%s2311_s24 + $0x18] sm:$0xff]  ;;  %s3400_s2 = sld [smem:[#allocation40_spill]]  ;;  %vm504_vm1 = vcmask 261120   ;;  %vm562_vm2 = vcmask 1041408  }
  0x50   : > { %v453_v8 = vmax.f32 %v2340_v6, %v2343_v7  ;;  %v2354_v9 = vld [vmem:[%s2311_s24 + $0x30] sm:$0xff]  ;;  %v2357_v10 = vld [vmem:[%s2311_s24 + $0x38] sm:$0xff]  ;;  %1968 = vset.pattern.permute.xlu2 %v2140_v12  ;;  %1962 = vset.pattern.permute.xlu0 %v2140_v12  ;;  %v450_v32 = vmax.f32 %v2334_v4, %v2337_v5  ;;  %v2374_v38 = vand.u32 127, %v462_v36  ;;  %s3401_s1 = sld [smem:[#allocation39_spill]]  ;;  %vm549_vm3 = vcmask 15360   ;;  %s2142_s16 = smov 3  }
  0x51   : > { %389 = vmatpush.msra.mxu0 %v2139_v0  ;;  %418 = vmatpush.msra.mxu1 %v2139_v0  ;;  %v459_v11 = vmax.f32 %v2354_v9, %v2357_v10  ;;  %s3402_s3 = sld [smem:[#allocation41_spill]]  ;;  %s2143_s15 = smov 1  }
  0x52   : > { %457 = vmax.xlane.f32.xlu1 %v456_v3  ;;  %vm464_vm0 = vcmp.eq.s32.totalorder %v2374_v38, 0  ;;  %s2466_s14 = sld [smem:[#allocation6 + $0x11]]  ;;  %s2144_s7 = smov 127  }
  0x53   : > { %390 = vmatpush.msra.mxu0 %v2139_v0  ;;  %419 = vmatpush.msra.mxu1 %v2139_v0  ;;  %s2468_s25 = sld [smem:[#allocation6 + $0x3]]  ;;  %s2145_s18 = smov 2  }
  0x54   : > { %460 = vmax.xlane.f32.xlu0 %v459_v11  ;;  %1974 = vset.pattern.permute.xlu1 %v2140_v12  ;;  %v497_v31 = vld [vmem:[%s3399_s4 + $0x10] sm:$0xff]  ;;  %v495_v33 = vld [vmem:[%s3399_s4] sm:$0xff]  ;;  %v498_v46 = vld [vmem:[%s3399_s4 + $0x18] sm:$0xff]  ;;  %s2471_s27 = sld [smem:[#allocation6 + $0xa]]  ;;  %s2146_s22 = smov 126  }
  0x55   : > { %391 = vmatpush.msra.mxu0 %v2139_v0  ;;  %420 = vmatpush.msra.mxu1 %v2139_v0  ;;  %v490_v37 = vld [vmem:[%s3400_s2] sm:$0x3]  ;;  %v496_v49 = vld [vmem:[%s3399_s4 + $0x8] sm:$0xff]  ;;  %s2473_s28 = sld [smem:[#allocation6 + $0x26]]  ;;  %s2147_s21 = smov 125  }
  0x56   : > { %v489_v52 = vld [vmem:[%s3401_s1] sm:$0x3]  ;;  %s2476_s19 = sld [smem:[#allocation6 + $0x1f]] }
  0x57   : > { %392 = vmatpush.msra.mxu0 %v2139_v0  ;;  %421 = vmatpush.msra.mxu1 %v2139_v0  ;;  %v491_v58 = vld [vmem:[%s3402_s3] sm:$0xff]  ;;  %v492_v59 = vld [vmem:[%s3402_s3 + $0x8] sm:$0xff]  ;;  %v493_v60 = vld [vmem:[%s3402_s3 + $0x10] sm:$0xff]  ;;  %s2478_s26 = sld [smem:[#allocation6 + $0x2d]] }
  0x58   : > { %v494_v61 = vld [vmem:[%s3402_s3 + $0x18] sm:$0xff]  ;;  %s2481_s29 = sld [smem:[#allocation6 + $0x18]] }
  0x59   : > { %393 = vmatpush.msra.mxu0 %v2139_v0  ;;  %422 = vmatpush.msra.mxu1 %v2139_v0  ;;  %s2524_s24 = sld [smem:[#allocation6 + $0x15]] }
  0x5a   : > { %454 = vmax.xlane.f32.xlu1 %v453_v8  ;;  %s3415_s5 = sld [smem:[#allocation43_spill]] }
  0x5b   : > { %394 = vmatpush.msra.mxu0 %v2139_v0  ;;  %423 = vmatpush.msra.mxu1 %v2139_v0  ;;  %s2531_s23 = sld [smem:[#allocation6 + $0x42]] }
  0x5c   : > { %s2743_s8 = sld [smem:[#allocation6 + $0x1c]] }
  0x5d   : > { %395 = vmatpush.msra.mxu0 %v2139_v0  ;;  %424 = vmatpush.msra.mxu1 %v2139_v0  ;;  %s2745_s20 = sld [smem:[#allocation6 + $0x23]] }
  0x5e   : > { %s2771_s30 = sld [smem:[#allocation6 + $0x2b]] }
  0x5f   : > { %396 = vmatpush.msra.mxu0 %v2139_v0  ;;  %425 = vmatpush.msra.mxu1 %v2139_v0  ;;  %s2773_s0 = sld [smem:[#allocation6 + $0x4]] }
  0x60   : > { %s2775_s1 = sld [smem:[#allocation6 + $0xb]] }
  0x61   : > { %397 = vmatpush.msra.mxu0 %v2139_v0  ;;  %426 = vmatpush.msra.mxu1 %v2139_v0  ;;  %s2777_s2 = sld [smem:[#allocation6 + $0x12]] }
  0x62   : > { %s2779_s3 = sld [smem:[#allocation6 + $0x20]] }
  0x63   : > { %398 = vmatpush.msra.mxu0 %v2139_v0  ;;  %427 = vmatpush.msra.mxu1 %v2139_v0  ;;  %s2781_s4 = sld [smem:[#allocation6 + $0x27]] }
  0x64   : > { %s2785_s11 = sld [smem:[#allocation6 + $0x6]] }
  0x65   : > { %399 = vmatpush.msra.mxu0 %v2139_v0  ;;  %428 = vmatpush.msra.mxu1 %v2139_v0  ;;  %s2787_s10 = sld [smem:[#allocation6 + $0xd]] }
  0x66   : > { %s2789_s12 = sld [smem:[#allocation6 + $0x14]] }
  0x67   : > { %400 = vmatpush.msra.mxu0 %v2139_v0  ;;  %429 = vmatpush.msra.mxu1 %v2139_v0  ;;  %s2791_s9 = sld [smem:[#allocation6 + $0x22]] }
  0x68   : > { %s2793_s17 = sld [smem:[#allocation6 + $0x29]] }
  0x69   : > { %401 = vmatpush.msra.mxu0 %v2139_v0  ;;  %430 = vmatpush.msra.mxu1 %v2139_v0  ;;  %s2795_s13 = sld [smem:[#allocation6 + $0x30]] }
  0x6a   : > { %s2797_s6 = sld [smem:[#allocation6 + $0x13]] }
  0x6b   : > { %402 = vmatpush.msra.mxu0 %v2139_v0  ;;  %431 = vmatpush.msra.mxu1 %v2139_v0 }
  0x6c   : > { %3432 = sst [smem:[#allocation36_spill]] %s2789_s12 }
  0x6d   : > { %403 = vmatpush.msra.mxu0 %v2139_v0  ;;  %432 = vmatpush.msra.mxu1 %v2139_v0  ;;  %s2804_s12 = sld [smem:[#allocation6 + $0xc]] }
  0x6e   : > { %404 = vmatmul.f32.vlgmr.msra.gmra.mxu0 %v2334_v4  ;;  %433 = vmatmul.f32.vlgmr.msra.gmra.mxu1 %v2337_v5 }
  0x70   : > { %3433 = sst [smem:[#allocation37_spill]] %s2797_s6 }
  0x71   : > { %s2810_s6 = sld [smem:[#allocation6 + $0x28]] }
  0x73   : > { %501 = vperm.xlu1 %1974, %v490_v37  }
  0x76   : > { %407 = vmatmul.f32.gmra.mxu0 %v2340_v6  ;;  %436 = vmatmul.f32.gmra.mxu1 %v2343_v7 }
  0x7b   : > { %546 = vperm.xlu1 %1974, %v498_v46  }
  0x7e   : > { %410 = vmatmul.f32.gmra.mxu0 %v2326_v1  ;;  %439 = vmatmul.f32.gmra.mxu1 %v2329_v2 }
  0x83   : > { %536 = vperm.xlu1 %1974, %v496_v49  }
  0x86   : > { %413 = vmatmul.f32.gmra.mxu0 %v2354_v9  ;;  %442 = vmatmul.f32.gmra.mxu1 %v2357_v10 }
  0xc5   : > { %v458_v35 = vpop.xlane.xlu1 %457 }
  0xc7   : > { %v461_v34 = vpop.xlane.xlu0 %460 }
  0xcd   : > { %v455_v47 = vpop.xlane.xlu1 %454 }
  0xe5   : > { %v502_v54 = vpop.permute.xlu1 %501 }
  0xeb   : > { %v405_v13 = vpop.f32.mrf.mxu0  ;;  %v434_v14 = vpop.f32.mrf.mxu1 }
  0xec   : > { %v435_v15 = vadd.f32 %v434_v14, %v405_v13 }
  0xed   : > { %v547_v62 = vpop.permute.xlu1 %546 }
  0xee   : > { %v446_v19 = vmul.f32 0.00390625, %v435_v15 }
  0xf3   : > { %v408_v16 = vpop.f32.mrf.mxu0  ;;  %v437_v17 = vpop.f32.mrf.mxu1 }
  0xf4   : > { %v438_v18 = vadd.f32 %v437_v17, %v408_v16 }
  0xf5   : > { %v537_v0 = vpop.permute.xlu1 %536 }
  0xf6   : > { %v447_v20 = vmul.f32 0.00390625, %v438_v18 }
  0xf8   : > { %v1969_v21 = vpack.i.bf16 %v446_v19, %v447_v20 }
  0xfa   : > { %1970 = vperm.xlu2 %1968, %v1969_v21  }
  0xfb   : > { %v411_v22 = vpop.f32.mrf.mxu0  ;;  %v440_v23 = vpop.f32.mrf.mxu1 }
  0xfc   : > { %v441_v24 = vadd.f32 %v440_v23, %v411_v22 }
  0xfe   : > { %v448_v27 = vmul.f32 0.00390625, %v441_v24 }
 0x103   : > { %v414_v25 = vpop.f32.mrf.mxu0  ;;  %v443_v26 = vpop.f32.mrf.mxu1 }
 0x104   : > { %v444_v28 = vadd.f32 %v443_v26, %v414_v25 }
 0x106   : > { %v449_v29 = vmul.f32 0.00390625, %v444_v28 }
 0x108   : > { %v1963_v30 = vpack.i.bf16 %v448_v27, %v449_v29 }
 0x10a   : > { %1964 = vperm.xlu0 %1962, %v1963_v30  }
 0x112   : > { %541 = vperm.xlu0 %1962, %v497_v31  }
 0x123   : > { %451 = vmax.xlane.f32.xlu2 %v450_v32 }
 0x13b   : > { %531 = vperm.xlu2 %1968, %v495_v33  }
 0x154   : > { %v1971_v39 = vpop.permute.xlu2 %1970 }
 0x155   : > { %v1972_v43 = vunpack.i.l.bf16 %v1971_v39  ;;  %v1973_v50 = vunpack.i.h.bf16 %v1971_v39 }
 0x157   : > { %v486_v48 = vsel %vm464_vm0, %v1972_v43, %v455_v47 }
 0x17c   : > { %v1965_v40 = vpop.permute.xlu0 %1964 }
 0x17d   : > { %v1967_v41 = vunpack.i.h.bf16 %v1965_v40  ;;  %v1966_v42 = vunpack.i.l.bf16 %v1965_v40 }
 0x17f   : > { %v488_v44 = vsel %vm464_vm0, %v1966_v42, %v461_v34  ;;  %v487_v45 = vsel %vm464_vm0, %v1967_v41, %v458_v35 }
 0x180   : > { %520 = vmatpush.msra.mxu2 %v488_v44 }
 0x182   : > { %521 = vmatpush.msra.mxu2 %v487_v45 }
 0x184   : > { %522 = vmatpush.msra.mxu2 %v486_v48  ;;  %v542_v12 = vpop.permute.xlu0 %541 }
 0x196   : > { %v452_v51 = vpop.xlane.xlu2 %451 }
 0x197   : > { %v485_v53 = vsel %vm464_vm0, %v1973_v50, %v452_v51 }
 0x198   : > { %523 = vmatpush.msra.mxu2 %v485_v53 }
 0x199   : > { %1758 = vmatmul.msk.f32.vlgmr.msra.gmra.mxu2 %vm504_vm1, %v489_v52 }
 0x19e   : > { %v532_v19 = vpop.permute.xlu2 %531 }
 0x21c   : > { %v525_v55 = vpop.f32.mrf.mxu2 }
 0x21d   : > { %v526_v56 = vadd.f32 %v525_v55, %v502_v54 }
 0x21f   : > { %v528_v57 = vmax.f32 %v526_v56, 0.0 }
 0x221   : > { %1759 = vmatpush.msk.msra.mxu3 %vm562_vm2, %v528_v57 }
 0x222   : > { %1760 = vmatmul.msk.f32.vlgmr.msra.gmra.mxu3 %vm549_vm3, %v491_v58 }
 0x22a   : > { %1761 = vmatmul.msk.f32.gmra.mxu3 %vm549_vm3, %v492_v59 }
 0x232   : > { %1762 = vmatmul.msk.f32.gmra.mxu3 %vm549_vm3, %v493_v60 }
 0x23a   : > { %1763 = vmatmul.msk.f32.gmra.mxu3 %vm549_vm3, %v494_v61 }
 0x2a5   : > { %v583_v63 = vpop.f32.mrf.mxu3 }
 0x2a6   : > { %v584_v20 = vadd.f32 %v583_v63, %v532_v19 }
 0x2a8   : > { %v595_v21 = vsel %vm549_vm3, %v584_v20, 0.0 }
 0x2ad   : > { %v586_v3 = vpop.f32.mrf.mxu3 }
 0x2ae   : > { %v587_v8 = vadd.f32 %v586_v3, %v537_v0 }
 0x2b0   : > { %v598_v11 = vsel %vm549_vm3, %v587_v8, 0.0 }
 0x2b1   : > { %599 = vadd.xlane.f32.xlu2 %v598_v11 }
 0x2b5   : > { %v589_v13 = vpop.f32.mrf.mxu3 }
 0x2b6   : > { %v590_v14 = vadd.f32 %v589_v13, %v542_v12 }
 0x2b8   : > { %v601_v15 = vsel %vm549_vm3, %v590_v14, 0.0 }
 0x2b9   : > { %602 = vadd.xlane.f32.xlu1 %v601_v15 }
 0x2bd   : > { %v592_v16 = vpop.f32.mrf.mxu3 }
 0x2be   : > { %v593_v17 = vadd.f32 %v592_v16, %v547_v62 }
 0x2c0   : > { %v604_v18 = vsel %vm549_vm3, %v593_v17, 0.0 }
 0x2c1   : > { %605 = vadd.xlane.f32.xlu0 %v604_v18 }
 0x2c9   : > { %596 = vadd.xlane.f32.xlu0 %v595_v21 }
 0x324   : > { %v600_v22 = vpop.xlane.xlu2 %599 }
 0x325   : > { %v608_v23 = vsub.f32 0.0, %v600_v22 }
 0x327   : > { %v613_v24 = vmul.f32 1.442695, %v608_v23 }
 0x329   : > { %1975 = vpow2.f32 %v613_v24 }
 0x32c   : > { %v603_v25 = vpop.xlane.xlu1 %602 }
 0x32d   : > { %v609_v26 = vsub.f32 0.0, %v603_v25 }
 0x32f   : > { %v615_v27 = vmul.f32 1.442695, %v609_v26  ;;  %v1976_v28 = vpop.eup %1975 }
 0x330   : > { %v620_v29 = vadd.f32 1.0, %v1976_v28 }
 0x331   : > { %1977 = vpow2.f32 %v615_v27 }
 0x332   : > { %1979 = vrcp.f32 %v620_v29  ;;  %vm643_vm9 = vweird.f32 %v620_v29  ;;  %v649_v62 = vand.u32 2147483648, %v620_v29  ;;  %v647_v8 = vand.u32 2147483647, %v620_v29 }
 0x334   : > { %v606_v30 = vpop.xlane.xlu0 %605  ;;  %v650_v19 = vor.u32 1.1754944e-38, %v649_v62  ;;  %vm648_vm15 = vcmp.eq.f32.partialorder %v647_v8, 8.507059e+37 }
 0x335   : > { %v610_v31 = vsub.f32 0.0, %v606_v30 }
 0x337   : > { %v1978_v32 = vpop.eup %1977  ;;  %v617_v33 = vmul.f32 1.442695, %v610_v31 }
 0x338   : > { %v621_v34 = vadd.f32 1.0, %v1978_v32  ;;  %v1980_v37 = vpop.eup %1979 }
 0x339   : > { %1981 = vpow2.f32 %v617_v33  ;;  %v639_v43 = vmul.f32 %v1980_v37, %v620_v29  ;;  %vm644_vm5 = vweird.f32 %v1980_v37 }
 0x33a   : > { %1983 = vrcp.f32 %v621_v34  ;;  %vm658_vm6 = vweird.f32 %v621_v34  ;;  %v662_v56 = vand.u32 2147483647, %v621_v34  ;;  %v664_v57 = vand.u32 2147483648, %v621_v34  ;;  %vm2422_vm11 = vmor %vm643_vm9, %vm644_vm5 }
 0x33b   : > { %v640_v46 = vsub.f32 1.0, %v639_v43  ;;  %vm768_vm5 = vcmask 1040384  }
 0x33c   : > { %v597_v35 = vpop.xlane.xlu0 %596  ;;  %vm663_vm13 = vcmp.eq.f32.partialorder %v662_v56, 8.507059e+37  ;;  %v665_v13 = vor.u32 1.1754944e-38, %v664_v57  ;;  %v1472_v56 = vstv %s2478_s26  ;;  %v1218_v57 = vstv %s2481_s29  ;;  %s2600_s26 = sld [smem:[#allocation6 + $0x19]] }
 0x33d   : > { %v607_v36 = vsub.f32 0.0, %v597_v35  ;;  %v641_v52 = vmul.f32 %v1980_v37, %v640_v46  ;;  %v2141_v35 = vmov 0.03125   ;;  %s2609_s29 = sld [smem:[#allocation6 + $0x5e]] }
 0x33f   : > { %v1982_v39 = vpop.eup %1981  ;;  %v611_v40 = vmul.f32 1.442695, %v607_v36  ;;  %v642_v60 = vadd.f32 %v1980_v37, %v641_v52  ;;  %v1380_v52 = vstv %s2473_s28  ;;  %s2545_s28 = sld [smem:[#allocation6 + $0x57]] }
 0x340   : > { %v1984_v41 = vpop.eup %1983  ;;  %v622_v42 = vadd.f32 1.0, %v1982_v39 }
 0x341   : > { %v654_v44 = vmul.f32 %v1984_v41, %v621_v34  ;;  %1985 = vpow2.f32 %v611_v40  ;;  %vm659_vm4 = vweird.f32 %v1984_v41  ;;  %v646_v16 = vsel %vm2422_vm11, %v1980_v37, %v642_v60 }
 0x342   : > { %1987 = vrcp.f32 %v622_v42  ;;  %v679_v55 = vand.u32 2147483648, %v622_v42  ;;  %v677_v59 = vand.u32 2147483647, %v622_v42  ;;  %vm2415_vm8 = vmor %vm658_vm6, %vm659_vm4  ;;  %vm673_vm10 = vweird.f32 %v622_v42 }
 0x343   : > { %v655_v45 = vsub.f32 1.0, %v654_v44  ;;  %v651_v22 = vsel %vm648_vm15, %v650_v19, %v646_v16 }
 0x344   : > { %v680_v12 = vor.u32 1.1754944e-38, %v679_v55  ;;  %vm678_vm14 = vcmp.eq.f32.partialorder %v677_v59, 8.507059e+37  ;;  %v2437_v27 = vmul.f32 %v651_v22, %v2340_v6  ;;  %v2450_v6 = vmul.f32 %v651_v22, %v2343_v7 }
 0x345   : > { %v656_v48 = vmul.f32 %v1984_v41, %v655_v45 }
 0x346   : > { %3409 = vst [vmem:[#allocation26_spill] sm:$0xff] %v2437_v27 }
 0x347   : > { %v1986_v47 = vpop.eup %1985  ;;  %v657_v54 = vadd.f32 %v1984_v41, %v656_v48  ;;  %3413 = vst [vmem:[#allocation30_spill] sm:$0xff] %v2450_v6 }
 0x348   : > { %v1988_v49 = vpop.eup %1987  ;;  %v619_v50 = vadd.f32 1.0, %v1986_v47  ;;  %v1126_v47 = vstv %s2466_s14  ;;  %s2534_s14 = sld [smem:[#allocation6 + $0x17]] }
 0x349   : > { %v669_v51 = vmul.f32 %v1988_v49, %v622_v42  ;;  %vm674_vm7 = vweird.f32 %v1988_v49  ;;  %v661_v0 = vsel %vm2415_vm8, %v1984_v41, %v657_v54  ;;  %vm821_vm8 = vcmp.lt.s32.totalorder %v2374_v38, 1 }
 0x34a   : > { %1989 = vrcp.f32 %v619_v50  ;;  %vm675_vm12 = vmor %vm673_vm10, %vm674_vm7  ;;  %v666_v18 = vsel %vm663_vm13, %v665_v13, %v661_v0  ;;  %v634_v23 = vand.u32 2147483648, %v619_v50  ;;  %v632_v26 = vand.u32 2147483647, %v619_v50 }
 0x34b   : > { %v670_v53 = vsub.f32 1.0, %v669_v51  ;;  %v2433_v24 = vmul.f32 %v666_v18, %v2326_v1  ;;  %vm628_vm2 = vweird.f32 %v619_v50  ;;  %v2447_v32 = vmul.f32 %v666_v18, %v2329_v2 }
 0x34c   : > { %vm633_vm4 = vcmp.eq.f32.partialorder %v632_v26, 8.507059e+37  ;;  %v1034_v51 = vstv %s2471_s27  ;;  %s2539_s27 = sld [smem:[#allocation6 + $0x3b]] }
 0x34d   : > { %v671_v58 = vmul.f32 %v1988_v49, %v670_v53  ;;  %3408 = vst [vmem:[#allocation25_spill] sm:$0xff] %v2433_v24  ;;  %v1288_v53 = vstv %s2476_s19  ;;  %s2551_s19 = sld [smem:[#allocation6 + $0x50]] }
 0x34e   : > { %3412 = vst [vmem:[#allocation29_spill] sm:$0xff] %v2447_v32 }
 0x34f   : > { %v672_v63 = vadd.f32 %v1988_v49, %v671_v58 }
 0x350   : > { %v1990_v11 = vpop.eup %1989 }
 0x351   : > { %v624_v14 = vmul.f32 %v1990_v11, %v619_v50  ;;  %v676_v15 = vsel %vm675_vm12, %v1988_v49, %v672_v63  ;;  %vm629_vm0 = vweird.f32 %v1990_v11  ;;  %v942_v50 = vstv %s2468_s25  ;;  %s2536_s25 = sld [smem:[#allocation6 + $0x34]] }
 0x352   : > { %v681_v17 = vsel %vm678_vm14, %v680_v12, %v676_v15  ;;  %vm630_vm3 = vmor %vm628_vm2, %vm629_vm0  ;;  %vm792_vm14 = vcmp.lt.s32.totalorder %v2374_v38, 2  ;;  %vm850_vm0 = vcmp.lt.s32.totalorder %v2374_v38, 127 }
 0x353   : > { %v2429_v20 = vmul.f32 %v681_v17, %v2354_v9  ;;  %v625_v21 = vsub.f32 1.0, %v624_v14  ;;  %v635_v9 = vor.u32 1.1754944e-38, %v634_v23  ;;  %v2440_v29 = vmul.f32 %v681_v17, %v2357_v10 }
 0x355   : > { %3407 = vst [vmem:[#allocation24_spill] sm:$0xff] %v2429_v20  ;;  %724 = vmatpush.msrb.mxu2 %v2429_v20  ;;  %v626_v25 = vmul.f32 %v1990_v11, %v625_v21  ;;  %v692_v10 = vmax.f32 %v2437_v27, %v2429_v20 }
 0x356   : > { %3410 = vst [vmem:[#allocation27_spill] sm:$0xff] %v2440_v29 }
 0x357   : > { %725 = vmatpush.msrb.mxu2 %v2433_v24  ;;  %v627_v28 = vadd.f32 %v1990_v11, %v626_v25 }
 0x359   : > { %726 = vmatpush.msrb.mxu2 %v2437_v27  ;;  %v631_v30 = vsel %vm630_vm3, %v1990_v11, %v627_v28 }
 0x35a   : > { %v636_v1 = vsel %vm633_vm4, %v635_v9, %v631_v30 }
 0x35b   : > { %v2444_v31 = vmul.f32 %v636_v1, %v2334_v4  ;;  %v2453_v33 = vmul.f32 %v636_v1, %v2337_v5  ;;  %v701_v4 = vmax.f32 %v2450_v6, %v2440_v29  ;;  %v2529_v1 = vld [vmem:[%s3415_s5] sm:$0x3]  ;;  %s2783_s5 = sld [smem:[#allocation6 + $0x2e]] }
 0x35d   : > { %3411 = vst [vmem:[#allocation28_spill] sm:$0xff] %v2444_v31  ;;  %v691_v34 = vmax.f32 %v2444_v31, %v2433_v24  ;;  %727 = vmatpush.msrb.mxu2 %v2444_v31  ;;  %v700_v2 = vmax.f32 %v2453_v33, %v2447_v32 }
 0x35e   : > { %3414 = vst [vmem:[#allocation31_spill] sm:$0xff] %v2453_v33  ;;  %1764 = vmatmul.msk.f32.vlgmr.msrb.gmra.mxu2 %vm504_vm1, %v2141_v35 }
 0x35f   : > { %v693_v7 = vmax.f32 %v691_v34, %v692_v10  ;;  %744 = vmatpush.msra.mxu2 %v2440_v29  ;;  %v702_v5 = vmax.f32 %v700_v2, %v701_v4  ;;  %v754_v34 = vadd.s32 4294967293, %v2529_v1 }
 0x361   : > { %v694_v36 = vrot.slane %v693_v7, 4  ;;  %745 = vmatpush.msra.mxu2 %v2447_v32  ;;  %v703_v37 = vrot.slane %v702_v5, 4  ;;  %vm755_vm6 = vcmp.ge.s32.totalorder %v754_v34, 0  ;;  %vm756_vm7 = vcmp.lt.s32.totalorder %v754_v34, 16  ;;  %3431 = sst [smem:[#allocation35_spill]] %s2783_s5 }
 0x362   : > { %vm2559_vm9 = vmand %vm755_vm6, %vm756_vm7  ;;  %vm908_vm7 = vcmp.lt.s32.totalorder %v2374_v38, 125  ;;  %s2799_s5 = sld [smem:[#allocation6 + $0x5]] }
 0x363   : > { %v695_v39 = vmax.f32 %v693_v7, %v694_v36  ;;  %746 = vmatpush.msra.mxu2 %v2450_v6  ;;  %v704_v40 = vmax.f32 %v702_v5, %v703_v37  ;;  %v813_v5 = vadd.s32 4294967295, %v2529_v1 }
 0x365   : > { %v696_v41 = vrot.slane %v695_v39, 2  ;;  %v705_v42 = vrot.slane %v704_v40, 2  ;;  %747 = vmatpush.msra.mxu2 %v2453_v33  ;;  %vm814_vm10 = vcmp.ge.s32.totalorder %v813_v5, 0  ;;  %vm815_vm11 = vcmp.lt.s32.totalorder %v813_v5, 16 }
 0x366   : > { %1765 = vmatmul.msk.f32.vlgmr.msra.gmra.mxu2 %vm504_vm1, %v2141_v35  ;;  %vm762_vm1 = vcmp.lt.s32.totalorder %v2374_v38, 3  ;;  %vm2581_vm12 = vmand %vm814_vm10, %vm815_vm11 }
 0x367   : > { %v697_v43 = vmax.f32 %v695_v39, %v696_v41  ;;  %v706_v44 = vmax.f32 %v704_v40, %v705_v42  ;;  %v1206_v42 = vstv %s2524_s24  ;;  %s2624_s24 = sld [smem:[#allocation6 + $0x49]] }
 0x369   : > { %v698_v45 = vrot.slane %v697_v43, 1  ;;  %v707_v46 = vrot.slane %v706_v44, 1 }
 0x36b   : > { %v699_v48 = vmax.f32 %v697_v43, %v698_v45  ;;  %v708_v49 = vmax.f32 %v706_v44, %v707_v46  ;;  %v1160_v44 = vstv %s2531_s23  ;;  %v976_v45 = vstv %s2536_s25  ;;  %s2747_s23 = sld [smem:[#allocation6 + $0x2a]] }
 0x36c   : > { %v1068_v46 = vstv %s2539_s27  ;;  %s2751_s25 = sld [smem:[#allocation6 + $0x9]] }
 0x36d   : > { %760 = vrot.lane.b32.xlu0 %v708_v49, %s2142_s16  ;;  %817 = vrot.lane.b32.xlu2 %v699_v48, %s2143_s15  ;;  %v1127_v54 = vmul.f32 %v1126_v47, %v699_v48  ;;  %v1128_v55 = vmul.f32 %v1126_v47, %v708_v49  ;;  %v943_v58 = vmul.f32 %v942_v50, %v699_v48  ;;  %v1214_v47 = vstv %s2534_s14  ;;  %s2749_s14 = sld [smem:[#allocation6 + $0x2]] }
 0x36e   : > { %758 = vrot.lane.b32.xlu1 %v699_v48, %s2142_s16  ;;  %v944_v59 = vmul.f32 %v942_v50, %v708_v49  ;;  %v1035_v60 = vmul.f32 %v1034_v51, %v699_v48  ;;  %v1036_v61 = vmul.f32 %v1034_v51, %v708_v49  ;;  %v1381_v63 = vmul.f32 %v1380_v52, %v699_v48  ;;  %s2753_s27 = sld [smem:[#allocation6 + $0x10]] }
 0x36f   : > { %v1131_v62 = vrot.slane %v1128_v55, 7  ;;  %v1382_v0 = vmul.f32 %v1380_v52, %v708_v49  ;;  %v1290_v3 = vmul.f32 %v1288_v53, %v708_v49  ;;  %v1289_v12 = vmul.f32 %v1288_v53, %v699_v48 }
 0x370   : > { %v947_v8 = vrot.slane %v944_v59, 7  ;;  %v1039_v11 = vrot.slane %v1036_v61, 7  ;;  %v1474_v13 = vmul.f32 %v1472_v56, %v708_v49  ;;  %v1473_v17 = vmul.f32 %v1472_v56, %v699_v48 }
 0x371   : > { %v2495_v14 = vsel %vm768_vm5, %v1127_v54, %v1131_v62  ;;  %v1385_v15 = vrot.slane %v1382_v0, 7  ;;  %v1293_v16 = vrot.slane %v1290_v3, 7  ;;  %v1220_v22 = vmul.f32 %v1218_v57, %v708_v49 }
 0x372   : > { %v2498_v18 = vsel %vm768_vm5, %v943_v58, %v947_v8  ;;  %v2501_v19 = vsel %vm768_vm5, %v1035_v60, %v1039_v11  ;;  %v1477_v21 = vrot.slane %v1474_v13, 7  ;;  %v1219_v28 = vmul.f32 %v1218_v57, %v699_v48 }
 0x373   : > { %v2504_v23 = vsel %vm768_vm5, %v1381_v63, %v1385_v15  ;;  %v2507_v25 = vsel %vm768_vm5, %v1289_v12, %v1293_v16  ;;  %v1223_v9 = vrot.slane %v1220_v22, 7  ;;  %v784_v50 = vadd.s32 4294967294, %v2529_v1 }
 0x374   : > { %v2510_v26 = vsel %vm768_vm5, %v1473_v17, %v1477_v21  ;;  %v1414_v51 = vstv %s2545_s28  ;;  %v1322_v56 = vstv %s2551_s19  ;;  %v842_v62 = vadd.s32 1, %v2529_v1  ;;  %s2755_s28 = sld [smem:[#allocation6 + $0x1e]] }
 0x375   : > { %846 = vrot.lane.b32.xlu0 %v699_v48, %s2144_s7  ;;  %790 = vrot.lane.b32.xlu2 %v708_v49, %s2145_s18  ;;  %v2516_v30 = vsel %vm768_vm5, %v1219_v28, %v1223_v9  ;;  %vm785_vm13 = vcmp.ge.s32.totalorder %v784_v50, 0  ;;  %vm786_vm15 = vcmp.lt.s32.totalorder %v784_v50, 16  ;;  %s2757_s19 = sld [smem:[#allocation6 + $0x25]] }
 0x376   : > { %819 = vrot.lane.b32.xlu1 %v708_v49, %s2143_s15  ;;  %vm843_vm2 = vcmp.ge.s32.totalorder %v842_v62, 0  ;;  %vm844_vm3 = vcmp.lt.s32.totalorder %v842_v62, 16  ;;  %vm2638_vm4 = vmand %vm785_vm13, %vm786_vm15  ;;  %vm879_vm15 = vcmp.lt.s32.totalorder %v2374_v38, 126 }
 0x377   : > { %vm2656_vm6 = vmand %vm843_vm2, %vm844_vm3 }
 0x37d   : > { %788 = vrot.lane.b32.xlu0 %v699_v48, %s2145_s18  ;;  %877 = vrot.lane.b32.xlu2 %v708_v49, %s2146_s22 }
 0x37e   : > { %848 = vrot.lane.b32.xlu1 %v708_v49, %s2144_s7 }
 0x385   : > { %906 = vrot.lane.b32.xlu0 %v708_v49, %s2147_s21 }
 0x386   : > { %904 = vrot.lane.b32.xlu1 %v699_v48, %s2147_s21 }
 0x38d   : > { %875 = vrot.lane.b32.xlu0 %v699_v48, %s2146_s22 }
 0x3c7   : > { %v818_v36 = vpop.permute.xlu2 %817 }
 0x3cf   : > { %v791_v22 = vpop.permute.xlu2 %790 }
 0x3df   : > { %v761_v10 = vpop.permute.xlu0 %760 }
 0x3e0   : > { %v759_v4 = vpop.permute.xlu1 %758 }
 0x3e1   : > { %v763_v2 = vsel %vm762_vm1, %v759_v4, %v761_v10  ;;  %v2543_v35 = vpop.f32.mrf.mxu2  ;;  %v764_v37 = vsel %vm762_vm1, %v761_v10, %v759_v4 }
 0x3e2   : > { %859 = vrot.lane.b32.xlu0 %v2543_v35, %s2144_s7  ;;  %772 = vrot.lane.b32.xlu2 %v2543_v35, %s2142_s16  ;;  %v767_v7 = vrot.slane %v763_v2, 7  ;;  %v1161_v8 = vmul.f32 %v1160_v44, %v2543_v35  ;;  %v977_v4 = vmul.f32 %v976_v45, %v2543_v35  ;;  %v1069_v2 = vmul.f32 %v1068_v46, %v2543_v35 }
 0x3e3   : > { %801 = vrot.lane.b32.xlu1 %v2543_v35, %s2145_s18 }
 0x3e4   : > { %v769_v40 = vsel %vm768_vm5, %v764_v37, %v767_v7  ;;  %v1415_v7 = vmul.f32 %v1414_v51, %v2543_v35 }
 0x3e5   : > { %v2579_v52 = vsel %vm2559_vm9, %v769_v40, 0.0  ;;  %v1323_v40 = vmul.f32 %v1322_v56, %v2543_v35 }
 0x3e6   : > { %v1207_v11 = vmul.f32 %v1206_v42, %v2579_v52 }
 0x3e7   : > { %v2564_v41 = vpop.permute.xlu0 %846 }
 0x3e8   : > { %v820_v43 = vpop.permute.xlu1 %819 }
 0x3e9   : > { %v822_v48 = vsel %vm821_vm8, %v818_v36, %v820_v43  ;;  %v2573_v49 = vpop.f32.mrf.mxu2  ;;  %v823_v57 = vsel %vm821_vm8, %v820_v43, %v818_v36 }
 0x3ea   : > { %v826_v54 = vrot.slane %v822_v48, 7  ;;  %803 = vrot.lane.b32.xlu0 %v2573_v49, %s2145_s18  ;;  %830 = vrot.lane.b32.xlu2 %v2543_v35, %s2143_s15  ;;  %v1162_v55 = vmul.f32 %v1160_v44, %v2573_v49  ;;  %v978_v58 = vmul.f32 %v976_v45, %v2573_v49  ;;  %v1070_v59 = vmul.f32 %v1068_v46, %v2573_v49  ;;  %s2614_s18 = sld [smem:[#allocation6 + $0x16]] }
 0x3eb   : > { %888 = vrot.lane.b32.xlu1 %v2543_v35, %s2146_s22  ;;  %v1416_v60 = vmul.f32 %v1414_v51, %v2573_v49  ;;  %v1324_v0 = vmul.f32 %v1322_v56, %v2573_v49  ;;  %v900_v51 = vadd.s32 3, %v2529_v1 }
 0x3ec   : > { %v827_v61 = vsel %vm768_vm5, %v823_v57, %v826_v54  ;;  %v1165_v63 = vrot.slane %v1162_v55, 7  ;;  %v981_v16 = vrot.slane %v978_v58, 7  ;;  %v1073_v17 = vrot.slane %v1070_v59, 7 }
 0x3ed   : > { %v2605_v3 = vsel %vm2581_vm12, %v827_v61, 0.0  ;;  %v1419_v21 = vrot.slane %v1416_v60, 7  ;;  %v1327_v10 = vrot.slane %v1324_v0, 7  ;;  %v1228_v55 = vstv %s2600_s26  ;;  %s2759_s26 = sld [smem:[#allocation6 + $0x2c]] }
 0x3ee   : > { %v1215_v12 = vmul.f32 %v1214_v47, %v2605_v3  ;;  %v2617_v15 = vsel %vm768_vm5, %v1161_v8, %v1165_v63  ;;  %v2645_v44 = vsel %vm768_vm5, %v977_v4, %v981_v16  ;;  %v2648_v45 = vsel %vm768_vm5, %v1069_v2, %v1073_v17 }
 0x3ef   : > { %v789_v13 = vpop.permute.xlu0 %788  ;;  %v2651_v46 = vsel %vm768_vm5, %v1415_v7, %v1419_v21  ;;  %v2667_v54 = vsel %vm768_vm5, %v1323_v40, %v1327_v10  ;;  %v1506_v57 = vstv %s2609_s29  ;;  %vm901_vm10 = vcmp.ge.s32.totalorder %v900_v51, 0  ;;  %s2761_s29 = sld [smem:[#allocation6 + $0x1]] }
 0x3f0   : > { %v1216_v28 = vadd.f32 %v1215_v12, %v1207_v11  ;;  %v849_v9 = vpop.permute.xlu1 %848  ;;  %v793_v34 = vsel %vm792_vm14, %v789_v13, %v791_v22  ;;  %v794_v5 = vsel %vm792_vm14, %v791_v22, %v789_v13  ;;  %v1508_v58 = vmul.f32 %v1506_v57, %v2573_v49 }
 0x3f1   : > { %v797_v36 = vrot.slane %v793_v34, 7  ;;  %v852_v37 = vsel %vm850_vm0, %v849_v9, %v2564_v41  ;;  %v851_v50 = vsel %vm850_vm0, %v2564_v41, %v849_v9  ;;  %v1210_v59 = vstv %s2614_s18  ;;  %s2763_s18 = sld [smem:[#allocation6 + $0x8]] }
 0x3f2   : > { %890 = vrot.lane.b32.xlu0 %v2573_v49, %s2146_s22  ;;  %861 = vrot.lane.b32.xlu2 %v2573_v49, %s2144_s7  ;;  %v855_v43 = vrot.slane %v852_v37, 7  ;;  %vm902_vm11 = vcmp.lt.s32.totalorder %v900_v51, 16  ;;  %v1252_v0 = vstv %s2624_s24  ;;  %v1511_v13 = vrot.slane %v1508_v58, 7  ;;  %s1812_s7 = sld [smem:[#allocation6 + $0x1a]]  ;;  %v878_v37 = vpop.permute.xlu2 %877 }
 0x3f3   : > { %774 = vrot.lane.b32.xlu1 %v2573_v49, %s2142_s16  ;;  %v798_v47 = vsel %vm768_vm5, %v794_v5, %v797_v36  ;;  %s2664_s16 = sld [smem:[#allocation6 + $0x1b]]  ;;  %vm2690_vm13 = vmand %vm901_vm10, %vm902_vm11  ;;  %v3424_v16 = vmov 0  ;;  %v871_v21 = vadd.s32 2, %v2529_v1  ;;  %v1254_v22 = vmul.f32 %v1252_v0, %v2573_v49 }
 0x3f4   : > { %v856_v56 = vsel %vm768_vm5, %v851_v50, %v855_v43  ;;  %v2676_v60 = vsel %vm2638_vm4, %v798_v47, 0.0  ;;  %v3425_v16 = vsel %vm2690_vm13, 4294967295, %v3424_v16  ;;  %v1507_v10 = vmul.f32 %v1506_v57, %v2543_v35  ;;  %s2739_s22 = sld [smem:[#allocation6 + $0x7]] }
 0x3f5   : > { %v2680_v41 = vsel %vm2656_vm6, %v856_v56, 0.0  ;;  %v1211_v8 = vmul.f32 %v1210_v59, %v2676_v60  ;;  %3426 = vst [vmem:[#allocation32_spill] sm:$0xff] %v3425_v16  ;;  %vm872_vm2 = vcmp.ge.s32.totalorder %v871_v21, 0  ;;  %vm873_vm3 = vcmp.lt.s32.totalorder %v871_v21, 16  ;;  %s2765_s24 = sld [smem:[#allocation6 + $0xf]] }
 0x3f6   : > { %v1229_v62 = vmul.f32 %v1228_v55, %v2680_v41  ;;  %v2709_v2 = vsel %vm768_vm5, %v1507_v10, %v1511_v13  ;;  %v1257_v36 = vrot.slane %v1254_v22, 7  ;;  %v1253_v43 = vmul.f32 %v1252_v0, %v2543_v35  ;;  %vm2716_vm10 = vmand %vm872_vm2, %vm873_vm3 }
 0x3f7   : > { %v907_v61 = vpop.permute.xlu0 %906  ;;  %v1226_v1 = vadd.f32 %v2516_v30, %v1211_v8  ;;  %v3427_v47 = vmov 0  ;;  %v1368_v0 = vstv %s2745_s20  ;;  %v1460_v8 = vstv %s2747_s23  ;;  %s2828_s20 = sld [smem:[#allocation6 + $0x43]] }
 0x3f8   : > { %v905_v63 = vpop.permute.xlu1 %904  ;;  %v1230_v11 = vadd.f32 %v1229_v62, %v1216_v28  ;;  %v3428_v47 = vsel %vm2716_vm10, 4294967295, %v3427_v47  ;;  %v1232_v51 = vstv %s1812_s7  ;;  %v2727_v56 = vsel %vm768_vm5, %v1253_v43, %v1257_v36  ;;  %s2769_s7 = sld [smem:[#allocation6 + $0x24]] }
 0x3f9   : > { %v910_v12 = vsel %vm908_vm7, %v907_v61, %v905_v63  ;;  %v1236_v28 = vstv %s2664_s16  ;;  %v909_v9 = vsel %vm908_vm7, %v905_v63, %v907_v61  ;;  %3429 = vst [vmem:[#allocation33_spill] sm:$0xff] %v3428_v47  ;;  %s2767_s16 = sld [smem:[#allocation6 + $0x1d]]  ;;  %v1276_v63 = vstv %s2743_s8 }
 0x3fa   : > { %917 = vrot.lane.b32.xlu2 %v2543_v35, %s2147_s21  ;;  %v913_v17 = vrot.slane %v910_v12, 7  ;;  %3430 = vst [vmem:[#allocation34_spill] sm:$0xff] %v2727_v56  ;;  %v1022_v61 = vstv %s2739_s22  ;;  %v1030_v12 = vstv %s2751_s25  ;;  %v1122_v13 = vstv %s2753_s27  ;;  %s3434_s22 = sld [smem:[#allocation35_spill]] }
 0x3fb   : > { %832 = vrot.lane.b32.xlu1 %v2573_v49, %s2143_s15  ;;  %s2737_s15 = sld [smem:[#allocation6]]  ;;  %v1376_v21 = vstv %s2757_s19  ;;  %v1468_v22 = vstv %s2759_s26  ;;  %v1118_v10 = vstv %s2765_s24  ;;  %v1023_v6 = vmul.f32 %v1022_v61, %v2579_v52 }
 0x3fc   : > { %v914_v34 = vsel %vm768_vm5, %v909_v9, %v913_v17  ;;  %v1284_v17 = vstv %s2755_s28  ;;  %v1026_v9 = vstv %s2763_s18  ;;  %s2822_s8 = sld [smem:[#allocation6 + $0x2f]]  ;;  %v1044_v36 = vstv %s2775_s1 }
 0x3fd   : > { %v2705_v4 = vsel %vm2690_vm13, %v914_v34, 0.0  ;;  %v1390_v43 = vstv %s2781_s4  ;;  %s2836_s23 = sld [smem:[#allocation6 + $0x35]]  ;;  %v1369_v32 = vmul.f32 %v1368_v0, %v2579_v52  ;;  %v1461_v24 = vmul.f32 %v1460_v8, %v2579_v52 }
 0x3fe   : > { %v1237_v7 = vmul.f32 %v1236_v28, %v2705_v4  ;;  %v934_v28 = vstv %s2761_s29  ;;  %s2842_s25 = sld [smem:[#allocation6 + $0x3c]]  ;;  %v1123_v61 = vmul.f32 %v1122_v13, %v2605_v3  ;;  %v1285_v33 = vmul.f32 %v1284_v17, %v2605_v3 }
 0x3ff   : > { %v876_v5 = vpop.permute.xlu0 %875  ;;  %v1280_v34 = vstv %s2767_s16  ;;  %s2854_s1 = sld [smem:[#allocation6 + $0x51]]  ;;  %v1377_v31 = vmul.f32 %v1376_v21, %v2605_v3  ;;  %v1119_v16 = vmul.f32 %v1118_v10, %v2676_v60  ;;  %v935_v47 = vmul.f32 %v934_v28, %v2676_v60 }
 0x400   : > { %v881_v40 = vsel %vm879_vm15, %v878_v37, %v876_v5  ;;  %v880_v30 = vsel %vm879_vm15, %v876_v5, %v878_v37  ;;  %v2724_v55 = vadd.f32 %v1237_v7, %v1230_v11  ;;  %v938_v11 = vstv %s2749_s14  ;;  %s3436_s14 = sld [smem:[#allocation37_spill]] }
 0x401   : > { %v884_v50 = vrot.slane %v881_v40, 7  ;;  %v1464_v7 = vstv %s2771_s30  ;;  %v952_v5 = vstv %s2773_s0  ;;  %v1136_v37 = vstv %s2777_s2  ;;  %s2848_s0 = sld [smem:[#allocation6 + $0x58]] }
 0x402   : > { %v1298_v40 = vstv %s2779_s3  ;;  %s2860_s2 = sld [smem:[#allocation6 + $0x40]]  ;;  %v1486_v13 = vstv %s2822_s8  ;;  %v1027_v56 = vmul.f32 %v1026_v9, %v2676_v60  ;;  %v953_v17 = vmul.f32 %v952_v5, %v2680_v41 }
 0x403   : > { %919 = vrot.lane.b32.xlu1 %v2573_v49, %s2147_s21  ;;  %v885_v57 = vsel %vm768_vm5, %v880_v30, %v884_v50  ;;  %s2741_s21 = sld [smem:[#allocation6 + $0xe]]  ;;  %v930_v49 = vstv %s2737_s15  ;;  %v1031_v30 = vmul.f32 %v1030_v12, %v2605_v3  ;;  %v1394_v12 = vstv %s2810_s6 }
 0x404   : > { %v2732_v35 = vsel %vm2716_vm10, %v885_v57, 0.0  ;;  %s2816_s15 = sld [smem:[#allocation6 + $0x21]]  ;;  %v931_v29 = vmul.f32 %v930_v49, %v2579_v52  ;;  %v939_v57 = vmul.f32 %v938_v11, %v2605_v3  ;;  %v1277_v49 = vmul.f32 %v1276_v63, %v2579_v52 }
 0x405   : > { %v1233_v58 = vmul.f32 %v1232_v51, %v2732_v35  ;;  %v1482_v51 = vstv %s3434_s22  ;;  %s2864_s3 = sld [smem:[#allocation6 + $0x32]]  ;;  %v1048_v11 = vstv %s2804_s12  ;;  %v1469_v63 = vmul.f32 %v1468_v22, %v2605_v3 }
 0x406   : > { %v1140_v20 = vstv %s3436_s14  ;;  %s2871_s4 = sld [smem:[#allocation6 + $0x39]]  ;;  %v940_v0 = vadd.f32 %v939_v57, %v931_v29  ;;  %v1032_v8 = vadd.f32 %v1031_v30, %v1023_v6  ;;  %v1137_v21 = vmul.f32 %v1136_v37, %v2680_v41 }
 0x407   : > { %v2735_v59 = vadd.f32 %v1233_v58, %v1226_v1  ;;  %v1372_v1 = vstv %s2769_s7  ;;  %s2875_s30 = sld [smem:[#allocation6 + $0x55]]  ;;  %v1045_v29 = vmul.f32 %v1044_v36, %v2680_v41  ;;  %v1391_v6 = vmul.f32 %v1390_v43, %v2680_v41 }
 0x408   : > { %v1373_v22 = vmul.f32 %v1372_v1, %v2676_v60  ;;  %s2887_s6 = sld [smem:[#allocation6 + $0x5c]]  ;;  %v1286_v10 = vadd.f32 %v1285_v33, %v1277_v49  ;;  %v1378_v30 = vadd.f32 %v1377_v31, %v1369_v32  ;;  %v1470_v28 = vadd.f32 %v1469_v63, %v1461_v24 }
 0x409   : > { %v1114_v62 = vstv %s2741_s21  ;;  %s3435_s21 = sld [smem:[#allocation36_spill]]  ;;  %v1281_v9 = vmul.f32 %v1280_v34, %v2676_v60  ;;  %v1465_v5 = vmul.f32 %v1464_v7, %v2676_v60  ;;  %v1483_v1 = vmul.f32 %v1482_v51, %v2680_v41 }
 0x40a   : > { %v1115_v27 = vmul.f32 %v1114_v62, %v2579_v52  ;;  %v956_v62 = vstv %s2799_s5  ;;  %v1302_v52 = vstv %s2816_s15  ;;  %s2882_s5 = sld [smem:[#allocation6 + $0x4e]]  ;;  %v1134_v31 = vadd.f32 %v2495_v14, %v1119_v16 }
 0x40b   : > { %s2892_s12 = sld [smem:[#allocation6 + $0x46]]  ;;  %v950_v33 = vadd.f32 %v2498_v18, %v935_v47  ;;  %v954_v60 = vadd.f32 %v953_v17, %v940_v0  ;;  %v1042_v34 = vadd.f32 %v2501_v19, %v1027_v56  ;;  %v1046_v7 = vadd.f32 %v1045_v29, %v1032_v8 }
 0x40c   : > { %v1124_v3 = vadd.f32 %v1123_v61, %v1115_v27  ;;  %v1299_v27 = vmul.f32 %v1298_v40, %v2680_v41  ;;  %s2900_s27 = sld [smem:[#allocation6 + $0x3f]]  ;;  %v1388_v37 = vadd.f32 %v2504_v23, %v1373_v22  ;;  %v1392_v14 = vadd.f32 %v1391_v6, %v1378_v30 }
 0x40d   : > { %s2902_s28 = sld [smem:[#allocation6 + $0x44]]  ;;  %v3437_v16 = vstv %s2785_s11  ;;  %v3438_v43 = vstv %s2787_s10  ;;  %v3439_v18 = vstv %s2791_s9  ;;  %v3440_v19 = vstv %s2793_s17 }
 0x40e   : > { %v1138_v32 = vadd.f32 %v1137_v21, %v1124_v3  ;;  %s2907_s19 = sld [smem:[#allocation6 + $0x31]]  ;;  %v961_v40 = vmul.f32 %v3437_v16, %v2705_v4  ;;  %v1053_v51 = vmul.f32 %v3438_v43, %v2705_v4  ;;  %v1307_v47 = vmul.f32 %v3439_v18, %v2705_v4 }
 0x40f   : > { %v1144_v58 = vstv %s3435_s21  ;;  %v1399_v56 = vmul.f32 %v3440_v19, %v2705_v4  ;;  %s2922_s26 = sld [smem:[#allocation7 + $0x3]]  ;;  %v957_v23 = vmul.f32 %v956_v62, %v2732_v35  ;;  %v1049_v49 = vmul.f32 %v1048_v11, %v2732_v35 }
 0x410   : > { %v1145_v41 = vmul.f32 %v1144_v58, %v2705_v4  ;;  %v1141_v58 = vmul.f32 %v1140_v20, %v2732_v35  ;;  %v1395_v61 = vmul.f32 %v1394_v12, %v2732_v35  ;;  %s2928_s11 = sld [smem:[#allocation6 + $0x47]]  ;;  %v1296_v63 = vadd.f32 %v2507_v25, %v1281_v9 }
 0x411   : > { %s2930_s10 = sld [smem:[#allocation6 + $0x36]]  ;;  %v1300_v0 = vadd.f32 %v1299_v27, %v1286_v10  ;;  %v1303_v8 = vmul.f32 %v1302_v52, %v2732_v35  ;;  %v1487_v17 = vmul.f32 %v1486_v13, %v2732_v35  ;;  %v3441_v21 = vstv %s2795_s13 }
 0x412   : > { %v2938_v20 = vmul.f32 %v3441_v21, %v2705_v4  ;;  %v2940_v62 = vadd.f32 %v1145_v41, %v1138_v32  ;;  %s2942_s9 = sld [smem:[#allocation6 + $0x38]]  ;;  %v1480_v11 = vadd.f32 %v2510_v26, %v1465_v5  ;;  %v2945_v12 = vadd.f32 %v1483_v1, %v1470_v28 }
 0x413   : > { %v2947_v3 = vadd.f32 %v961_v40, %v954_v60  ;;  %v2949_v25 = vadd.f32 %v1053_v51, %v1046_v7  ;;  %s2951_s17 = sld [smem:[#allocation6 + $0x3d]]  ;;  %v2953_v35 = vadd.f32 %v1399_v56, %v1392_v14  ;;  %v2955_v52 = vadd.f32 %v1307_v47, %v1300_v0 }
 0x414   : > { %v1142_v13 = vadd.f32 %v1141_v58, %v1134_v31  ;;  %v958_v22 = vadd.f32 %v957_v23, %v950_v33  ;;  %v1050_v29 = vadd.f32 %v1049_v49, %v1042_v34  ;;  %v1396_v26 = vadd.f32 %v1395_v61, %v1388_v37  ;;  %s2957_s13 = sld [smem:[#allocation6 + $0x54]] }
 0x415   : > { %s2963_s29 = sld [smem:[#allocation6 + $0x41]]  ;;  %v1170_v28 = vstv %s2828_s20  ;;  %v1304_v9 = vadd.f32 %v1303_v8, %v1296_v63  ;;  %v2966_v5 = vadd.f32 %v1487_v17, %v1480_v11  ;;  %v1152_v31 = vstv %s2860_s2 }
 0x416   : > { %s2972_s18 = sld [smem:[#allocation6 + $0x33]]  ;;  %v986_v32 = vstv %s2836_s23  ;;  %v968_v60 = vstv %s2864_s3  ;;  %v1060_v34 = vstv %s2871_s4  ;;  %v1406_v41 = vstv %s2875_s30 }
 0x417   : > { %s1558_s24 = sadd.f32 1e-05, %s2922_s26  ;;  %v1078_v37 = vstv %s2842_s25  ;;  %v1314_v14 = vstv %s2882_s5  ;;  %v1244_v16 = vstv %s2928_s11  ;;  %v1424_v51 = vstv %s2848_s0  ;;  %s2149_s26 = smov 48  }
 0x418   : > { %s2982_s16 = sld [smem:[#allocation6 + $0x3a]]  ;;  %v1498_v49 = vstv %s2887_s6  ;;  %v1240_v21 = vstv %s2892_s12  ;;  %s2150_s0 = smov 32   ;;  %vm1353_vm11 = vcmp.lt.s32.totalorder %v2374_v38, 112 }
 0x419   : > { %s2989_s7 = sld [smem:[#allocation6 + $0x56]]  ;;  %v2995_v23 = vstv %s1558_s24 }
 0x41a   : > { %s2993_s15 = sld [smem:[#allocation6 + $0x4d]]  ;;  %1991 = vrsqrt.f32 %v2995_v23 }
 0x41b   : > { %s2997_s22 = sld [smem:[#allocation6 + $0x5b]] }
 0x41c   : > { %s3000_s21 = sld [smem:[#allocation6 + $0x4a]] }
 0x41d   : > { %s3007_s8 = sld [smem:[#allocation6 + $0x4f]] }
 0x41e   : > { %s3016_s14 = sld [smem:[#allocation6 + $0x45]] }
 0x41f   : > { %s3046_s2 = sld [smem:[#allocation6 + $0x37]] }
 0x420   : > { %s3054_s3 = sld [smem:[#allocation6 + $0x3e]] }
 0x421   : > { %v1494_v39 = vstv %s2997_s22  ;;  %s3062_s4 = sld [smem:[#allocation6 + $0x4b]] }
 0x422   : > { %s3068_s30 = sld [smem:[#allocation6 + $0x48]] }
 0x423   : > { %s3128_s20 = sld [smem:[#allocation6 + $0x59]] }
 0x424   : > { %s3136_s23 = sld [smem:[#allocation6 + $0x4c]] }
 0x425   : > { %s3139_s25 = sld [smem:[#allocation6 + $0x5a]] }
 0x426   : > { %s3147_s5 = sld [smem:[#allocation6 + $0x53]] }
 0x427   : > { %s3154_s6 = sld [smem:[#allocation6 + $0x52]] }
 0x428   : > { %s3161_s12 = sld [smem:[#allocation6 + $0x5d]] }
 0x429   : > { %s3200_s11 = sld [smem:[#allocation6 + $0x60]] }
 0x42a   : > { %s3270_s24 = sld [smem:[#allocation7]] }
 0x43c   : > { %v2834_v50 = vpop.permute.xlu2 %772 }
 0x444   : > { %v2890_v57 = vpop.permute.xlu2 %830 }
 0x44c   : > { %v862_v6 = vpop.permute.xlu2 %861 }
 0x454   : > { %v2897_v36 = vpop.permute.xlu0 %859 }
 0x455   : > { %v802_v24 = vpop.permute.xlu1 %801  ;;  %v864_v27 = vsel %vm850_vm0, %v862_v6, %v2897_v36  ;;  %v863_v17 = vsel %vm850_vm0, %v2897_v36, %v862_v6 }
 0x456   : > { %v867_v40 = vrot.slane %v864_v27, 7 }
 0x458   : > { %v868_v27 = vsel %vm768_vm5, %v863_v17, %v867_v40 }
 0x45c   : > { %v804_v4 = vpop.permute.xlu0 %803 }
 0x45d   : > { %v805_v10 = vsel %vm792_vm14, %v802_v24, %v804_v4  ;;  %v2961_v30 = vpop.permute.xlu1 %888  ;;  %v806_v33 = vsel %vm792_vm14, %v804_v4, %v802_v24  ;;  %v1332_v24 = vstv %s2854_s1  ;;  %v1148_v4 = vstv %s2900_s27  ;;  %s3179_s27 = sld [smem:[#allocation6 + $0x5f]]  ;;  %s2151_s1 = smov 96  }
 0x45e   : > { %v809_v1 = vrot.slane %v805_v10, 7 }
 0x460   : > { %v810_v7 = vsel %vm768_vm5, %v806_v33, %v809_v1  ;;  %v1174_v33 = vstv %s2902_s28  ;;  %s3185_s28 = sld [smem:[#allocation6 + $0x61]] }
 0x461   : > { %v812_v43 = vsel %vm2638_vm4, %v810_v7, 0.0  ;;  %v1402_v7 = vstv %s2957_s13  ;;  %vm1191_vm4 = vcmp.lt.s32.totalorder %v2374_v38, 16 }
 0x462   : > { %v1153_v18 = vmul.f32 %v1152_v31, %v812_v43  ;;  %v969_v47 = vmul.f32 %v968_v60, %v812_v43  ;;  %v1061_v19 = vmul.f32 %v1060_v34, %v812_v43  ;;  %v1407_v56 = vmul.f32 %v1406_v41, %v812_v43 }
 0x463   : > { %v1315_v58 = vmul.f32 %v1314_v14, %v812_v43  ;;  %v1245_v42 = vmul.f32 %v1244_v16, %v812_v43  ;;  %v1499_v31 = vmul.f32 %v1498_v49, %v812_v43  ;;  %v964_v60 = vstv %s2907_s19  ;;  %v1992_v16 = vpop.eup %1991  ;;  %s2148_s19 = smov 16  }
 0x464   : > { %v1154_v61 = vadd.f32 %v1153_v18, %v1142_v13  ;;  %v970_v63 = vadd.f32 %v969_v47, %v958_v22  ;;  %v1062_v0 = vadd.f32 %v1061_v19, %v1050_v29  ;;  %v1408_v8 = vadd.f32 %v1407_v56, %v1396_v26  ;;  %v891_v1 = vpop.permute.xlu0 %890 }
 0x465   : > { %v775_v11 = vpop.permute.xlu1 %774  ;;  %v1316_v10 = vadd.f32 %v1315_v58, %v1304_v9  ;;  %v1056_v34 = vstv %s2942_s9  ;;  %v3052_v41 = vsel %vm2656_vm6, %v868_v27, 0.0  ;;  %v1310_v14 = vstv %s2993_s15  ;;  %s2153_s9 = smov 80  }
 0x466   : > { %v776_v13 = vsel %vm762_vm1, %v2834_v50, %v775_v11  ;;  %v3014_v22 = vadd.f32 %v2617_v15, %v1154_v61  ;;  %v3020_v29 = vadd.f32 %v2645_v44, %v970_v63  ;;  %v3023_v26 = vadd.f32 %v2648_v45, %v1062_v0 }
 0x467   : > { %v780_v36 = vrot.slane %v776_v13, 7  ;;  %v3026_v6 = vadd.f32 %v2651_v46, %v1408_v8  ;;  %v777_v15 = vsel %vm762_vm1, %v775_v11, %v2834_v50  ;;  %v3032_v9 = vadd.f32 %v2667_v54, %v1316_v10 }
 0x468   : > { %v1246_v44 = vadd.f32 %v1245_v42, %v2735_v59  ;;  %v893_v45 = vsel %vm879_vm15, %v891_v1, %v2961_v30  ;;  %v990_v54 = vstv %s2930_s10  ;;  %v1082_v59 = vstv %s2951_s17  ;;  %s2152_s10 = smov 112  }
 0x469   : > { %v781_v46 = vsel %vm768_vm5, %v777_v15, %v780_v36  ;;  %v896_v40 = vrot.slane %v893_v45, 7  ;;  %v1156_v43 = vstv %s2963_s29  ;;  %v1500_v18 = vadd.f32 %v1499_v31, %v2966_v5  ;;  %v3442_v15 = vld [vmem:[#allocation34_spill] sm:$0xff] }
 0x46a   : > { %v3043_v50 = vsel %vm2559_vm9, %v781_v46, 0.0  ;;  %v1262_v47 = vstv %s3000_s21  ;;  %v972_v56 = vstv %s2972_s18  ;;  %v1064_v58 = vstv %s2982_s16  ;;  %s3445_s18 = sld [smem:[#allocation44_spill]] }
 0x46b   : > { %v1241_v48 = vmul.f32 %v1240_v21, %v3043_v50  ;;  %v1410_v49 = vstv %s2989_s7  ;;  %v1171_v61 = vmul.f32 %v1170_v28, %v3052_v41  ;;  %v1178_v5 = vstv %s3016_s14  ;;  %s1864_s16 = sld [smem:[#allocation7 + $0x2]] }
 0x46c   : > { %v1318_v63 = vstv %s3007_s8  ;;  %v892_v0 = vsel %vm879_vm15, %v2961_v30, %v891_v1  ;;  %v987_v17 = vmul.f32 %v986_v32, %v3052_v41  ;;  %v1561_v21 = vmul.f32 %v1992_v16, %v2995_v23  ;;  %s1863_s7 = sld [smem:[#allocation7 + $0x1]] }
 0x46d   : > { %v833_v19 = vpop.permute.xlu1 %832  ;;  %v897_v11 = vsel %vm768_vm5, %v892_v0, %v896_v40  ;;  %v1149_v10 = vmul.f32 %v1148_v4, %v3043_v50  ;;  %v3091_v27 = vadd.f32 %v2709_v2, %v1500_v18  ;;  %v965_v32 = vmul.f32 %v964_v60, %v3043_v50  ;;  %s3454_s21 = sld [smem:[#allocation18_spill]] }
 0x46e   : > { %v834_v42 = vsel %vm821_vm8, %v2890_v57, %v833_v19  ;;  %v835_v28 = vsel %vm821_vm8, %v833_v19, %v2890_v57  ;;  %v1562_v1 = vmul.f32 %v1992_v16, %v1561_v21  ;;  %v1242_v13 = vadd.f32 %v1241_v48, %v2724_v55  ;;  %v918_v48 = vpop.permute.xlu2 %917  ;;  %s3455_s8 = sld [smem:[#allocation23_spill]] }
 0x46f   : > { %v838_v8 = vrot.slane %v834_v42, 7  ;;  %v1079_v57 = vmul.f32 %v1078_v37, %v3052_v41  ;;  %v3104_v4 = vadd.f32 %v3442_v15, %v1246_v44  ;;  %v3107_v2 = vmul.f32 %v1262_v47, %v3052_v41 }
 0x470   : > { %v3111_v45 = vsel %vm2716_vm10, %v897_v11, 0.0  ;;  %v1057_v46 = vmul.f32 %v1056_v34, %v3043_v50  ;;  %v994_v60 = vstv %s3046_s2  ;;  %v1086_v40 = vstv %s3054_s3 }
 0x471   : > { %v839_v30 = vsel %vm768_vm5, %v835_v28, %v838_v8  ;;  %v1563_v37 = vmul.f32 0.5, %v1562_v1  ;;  %v1266_v18 = vstv %s3062_s4  ;;  %v1150_v47 = vadd.f32 %v1149_v10, %v2940_v62  ;;  %s3460_s4 = sld [smem:[#allocation47_spill]] }
 0x472   : > { %v3098_v36 = vsel %vm2581_vm12, %v839_v30, 0.0  ;;  %v966_v19 = vadd.f32 %v965_v32, %v2947_v3  ;;  %v1248_v0 = vstv %s3068_s30  ;;  %v991_v34 = vmul.f32 %v990_v54, %v3111_v45 }
 0x473   : > { %v1157_v55 = vmul.f32 %v1156_v43, %v3098_v36  ;;  %v973_v53 = vmul.f32 %v972_v56, %v3098_v36  ;;  %v1065_v42 = vmul.f32 %v1064_v58, %v3098_v36  ;;  %v1175_v56 = vmul.f32 %v1174_v33, %v3111_v45  ;;  %s1872_s14 = sshll.u32 %s3454_s21, 6 }
 0x474   : > { %v1564_v8 = vsub.f32 1.5, %v1563_v37  ;;  %v1058_v30 = vadd.f32 %v1057_v46, %v2949_v25  ;;  %v1083_v3 = vmul.f32 %v1082_v59, %v3111_v45  ;;  %v1403_v58 = vmul.f32 %v1402_v7, %v3043_v50 }
 0x475   : > { %v920_v44 = vpop.permute.xlu1 %919  ;;  %v1158_v11 = vadd.f32 %v1157_v55, %v1150_v47  ;;  %v974_v28 = vadd.f32 %v973_v53, %v966_v19  ;;  %vm1567_vm1 = vcmp.eq.f32.partialorder %v2995_v23, inf  ;;  %vm1569_vm8 = vcmp.eq.f32.partialorder %v2995_v23, 0.0 }
 0x476   : > { %v922_v43 = vsel %vm908_vm7, %v920_v44, %v918_v48  ;;  %v921_v62 = vsel %vm908_vm7, %v918_v48, %v920_v44  ;;  %v1565_v10 = vmul.f32 %v1992_v16, %v1564_v8  ;;  %v1066_v54 = vadd.f32 %v1065_v42, %v1058_v30 }
 0x477   : > { %v925_v21 = vrot.slane %v922_v43, 7  ;;  %v1570_v7 = vand.u32 2147483648, %v2995_v23  ;;  %v1249_v16 = vmul.f32 %v1248_v0, %v3098_v36  ;;  %v1172_v1 = vadd.f32 %v1171_v61, %v1158_v11  ;;  %s1646_s30 = scalar_lea.hbm %s3460_s4, %s1872_s14 }
 0x478   : > { %v1566_v59 = vmul.f32 %v1565_v10, %v2995_v23  ;;  %v988_v31 = vadd.f32 %v987_v17, %v974_v28  ;;  %v1176_v53 = vadd.f32 %v1175_v56, %v3014_v22  ;;  %v1311_v46 = vmul.f32 %v1310_v14, %v3043_v50 }
 0x479   : > { %v926_v33 = vsel %vm768_vm5, %v921_v62, %v925_v21  ;;  %v1267_v48 = vmul.f32 %v1266_v18, %v3111_v45  ;;  %v1404_v44 = vadd.f32 %v1403_v58, %v2953_v35  ;;  %v1411_v22 = vmul.f32 %v1410_v49, %v3098_v36 }
 0x47a   : > { %v3145_v32 = vsel %vm2690_vm13, %v926_v33, 0.0  ;;  %v1568_v37 = vsel %vm1567_vm1, %v2995_v23, %v1566_v59  ;;  %v1250_v47 = vadd.f32 %v1249_v16, %v1242_v13  ;;  %v1080_v42 = vadd.f32 %v1079_v57, %v1066_v54 }
 0x47b   : > { %v1179_v15 = vmul.f32 %v1178_v5, %v3145_v32  ;;  %v995_v55 = vmul.f32 %v994_v60, %v3145_v32  ;;  %v992_v5 = vadd.f32 %v991_v34, %v3020_v29  ;;  %v1087_v60 = vmul.f32 %v1086_v40, %v3145_v32 }
 0x47c   : > { %v1571_v14 = vsel %vm1569_vm8, %v1570_v7, %v1568_v37  ;;  %v1319_v29 = vmul.f32 %v1318_v63, %v3098_v36  ;;  %v1312_v40 = vadd.f32 %v1311_v46, %v2955_v52  ;;  %v1264_v35 = vadd.f32 %v3107_v2, %v1250_v47 }
 0x47d   : > { %v1180_v61 = vadd.f32 %v1179_v15, %v1172_v1  ;;  %v996_v17 = vadd.f32 %v995_v55, %v988_v31  ;;  %1873 = vpush %v1571_v14  ;;  %v1268_v49 = vadd.f32 %v1267_v48, %v3104_v4  ;;  %v1270_v0 = vstv %s3136_s23 }
 0x47e   : > { %v1088_v56 = vadd.f32 %v1087_v60, %v1080_v42  ;;  %v1084_v57 = vadd.f32 %v1083_v3, %v3023_v26  ;;  %v1428_v63 = vstv %s3128_s20  ;;  %v1432_v52 = vstv %s3139_s25  ;;  %s3462_s20 = sshll.u32 %s3455_s8, 6 }
 0x47f   : > { %v1181_v19 = vadd.f32 %v1180_v61, %v1176_v53  ;;  %v997_v18 = vadd.f32 %v996_v17, %v992_v5  ;;  %v1340_v34 = vstv %s3147_s5  ;;  %v1412_v4 = vadd.f32 %v1411_v22, %v1404_v44  ;;  %s379_s23 = scalar_lea.vmem [#allocation9], %s3462_s20 }
 0x480   : > { %v1320_v2 = vadd.f32 %v1319_v29, %v1312_v40  ;;  %v1336_v8 = vstv %s3154_s6  ;;  %v1271_v21 = vmul.f32 %v1270_v0, %v3145_v32  ;;  %v1425_v26 = vmul.f32 %v1424_v51, %v3052_v41  ;;  %s1647_s25 = sshll.u32 %s379_s23, 4  ;;  %s1649_s6 = sshll.u32 %s1646_s30, 4  ;;  %s1648_s25 = int_to_ptr.vmem [resolvable:$true] %s1647_s25  ;;  %s1650_s6 = int_to_ptr.hbm [resolvable:$true] %s1649_s6 }
 0x481   : > { %v1183_v23 = vperm.slane %v1181_v19, 0  ;;  %v1000_v13 = vperm.slane %v997_v18, 1  ;;  %v999_v43 = vperm.slane %v997_v18, 0  ;;  %v1333_v11 = vmul.f32 %v1332_v24, %v3052_v41 }
 0x482   : > { %v1495_v28 = vmul.f32 %v1494_v39, %v3043_v50  ;;  %v1502_v30 = vstv %s3161_s12  ;;  %v1089_v62 = vadd.f32 %v1088_v56, %v1084_v57  ;;  %v1433_v3 = vmul.f32 %v1432_v52, %v3145_v32  ;;  %s1635_s12 = scalar_lea.sflag [#allocation4], %s3455_s8 }
 0x483   : > { %1187 = vrot.lane.b32.xlu1 %v1183_v23, %s2148_s19  ;;  %1005 = vrot.lane.b32.xlu2 %v1000_v13, %s2149_s26  ;;  %v1341_v58 = vmul.f32 %v1340_v34, %v3145_v32  ;;  %v1272_v10 = vadd.f32 %v1271_v21, %v1264_v35  ;;  %v1429_v33 = vmul.f32 %v1428_v63, %v3111_v45  ;;  %v1184_v31 = vperm.slane %v1181_v19, 1 }
 0x484   : > { %1003 = vrot.lane.b32.xlu0 %v999_v43, %s2149_s26  ;;  %v1337_v51 = vmul.f32 %v1336_v8, %v3111_v45  ;;  %v1492_v24 = vadd.f32 %v2938_v20, %v2945_v12  ;;  %v1426_v54 = vadd.f32 %v1425_v26, %v1412_v4  ;;  %v1334_v50 = vadd.f32 %v1333_v11, %v1320_v2  ;;  %v753_v4 = vld [vmem:[%s3445_s18] sm:$0x3] }
 0x485   : > { %v1503_v39 = vmul.f32 %v1502_v30, %v3098_v36  ;;  %v3209_v25 = vadd.f32 %v1272_v10, %v1268_v49  ;;  %v1092_v7 = vperm.slane %v1089_v62, 1  ;;  %v1091_v16 = vperm.slane %v1089_v62, 0 }
 0x486   : > { %v1496_v59 = vadd.f32 %v1495_v28, %v1492_v24  ;;  %v1434_v1 = vadd.f32 %v1433_v3, %v1426_v54  ;;  %v1342_v15 = vadd.f32 %v1341_v58, %v1334_v50  ;;  %v1516_v55 = vstv %s3179_s27  ;;  %s2073_s27 = sshra.s32 %s1650_s6, 4  ;;  %s2074_s27 = int_to_ptr.hbm [resolvable:$true] %s2073_s27 }
 0x487   : > { %v1524_v53 = vstv %s3185_s28  ;;  %v1430_v20 = vadd.f32 %v1429_v33, %v3026_v6  ;;  %v1338_v12 = vadd.f32 %v1337_v51, %v3032_v9  ;;  %v1520_v36 = vstv %s3200_s11  ;;  %s2075_s28 = scalar_lea.hbm %s2074_s27, 64  ;;  %p2080_p0 = scmp.lt.s32.totalorder %s2074_s27, %s3460_s4 }
 0x488   : > { %v1504_v46 = vadd.f32 %v1503_v39, %v1496_v59  ;;  %v1517_v61 = vmul.f32 %v1516_v55, %v3052_v41  ;;  %v1525_v5 = vmul.f32 %v1524_v53, %v3145_v32  ;;  %v1521_v60 = vmul.f32 %v1520_v36, %v3111_v45  ;;  %p2076_p4 = scmp.ne.s32.totalorder %s2074_s27, %s2075_s28 }
 0x489   : > { %v1435_v37 = vadd.f32 %v1434_v1, %v1430_v20  ;;  %v1343_v48 = vadd.f32 %v1342_v15, %v1338_v12  ;;  %vm1007_vm6 = vcmp.lt.s32.totalorder %v2374_v38, 48  ;;  %v1010_v2 = vadd.s32 4294967293, %v753_v4  ;;  %v3463_v1 = vld [vmem:[#allocation29_spill] sm:$0xff] }
 0x48a   : > { %v1518_v17 = vadd.f32 %v1517_v61, %v1504_v46  ;;  %v1522_v6 = vadd.f32 %v1521_v60, %v3091_v27  ;;  %vm1099_vm7 = vcmp.lt.s32.totalorder %v2374_v38, 32  ;;  %v1194_v8 = vadd.s32 4294967295, %v753_v4  ;;  %p2077_p6 = pnand %p2076_p4, %p2257_p11 }
 0x48b   : > { %1097 = vrot.lane.b32.xlu1 %v1092_v7, %s2150_s0  ;;  %1095 = vrot.lane.b32.xlu2 %v1091_v16, %s2150_s0  ;;  %v1437_v44 = vperm.slane %v1435_v37, 0  ;;  %v1346_v22 = vperm.slane %v1343_v48, 1  ;;  %v1345_v47 = vperm.slane %v1343_v48, 0  ;;  %v1438_v41 = vperm.slane %v1435_v37, 1  ;;  %s2079_s0 = scalar_lea.hbm %s3460_s4, 128 }
 0x48c   : > { %1189 = vrot.lane.b32.xlu0 %v1184_v31, %s2148_s19  ;;  %v1526_v14 = vadd.f32 %v1525_v5, %v1518_v17  ;;  %v1356_v11 = vadd.s32 1, %v753_v4  ;;  %v1102_v30 = vadd.s32 4294967294, %v753_v4  ;;  %vm1011_vm13 = vcmp.ge.s32.totalorder %v1010_v2, 0  ;;  %p2078_p13 = pneg %p2077_p6  ;;  %p2081_p7 = scmp.lt.s32.totalorder %s2079_s0, %s2075_s28 }
 0x48d   : > { %vm1012_vm15 = vcmp.lt.s32.totalorder %v1010_v2, 16  ;;  %vm1195_vm2 = vcmp.ge.s32.totalorder %v1194_v8, 0  ;;  %vm1196_vm3 = vcmp.lt.s32.totalorder %v1194_v8, 16  ;;  %v1540_v24 = vadd.s32 3, %v753_v4 }
 0x48e   : > { %v1527_v9 = vadd.f32 %v1526_v14, %v1522_v6  ;;  %vm1357_vm10 = vcmp.ge.s32.totalorder %v1356_v11, 0  ;;  %vm1358_vm1 = vcmp.lt.s32.totalorder %v1356_v11, 16  ;;  %vm1103_vm8 = vcmp.ge.s32.totalorder %v1102_v30, 0  ;;  %p2082_p5 = por %p2081_p7, %p2080_p0 }
 0x48f   : > { %v1448_v16 = vadd.s32 2, %v753_v4 }
 0x490   : > { %v1530_v19 = vperm.slane %v1527_v9, 1  ;;  %v1529_v18 = vperm.slane %v1527_v9, 0  ;;  %p2083_p8 = pnand %p2082_p5, %p2078_p13 }
 0x493   : > { %1441 = vrot.lane.b32.xlu1 %v1437_v44, %s2151_s1  ;;  %1351 = vrot.lane.b32.xlu2 %v1346_v22, %s2152_s10 }
 0x494   : > { %1349 = vrot.lane.b32.xlu0 %v1345_v47, %s2152_s10 }
 0x49b   : > { %1535 = vrot.lane.b32.xlu1 %v1530_v19, %s2153_s9  ;;  %1533 = vrot.lane.b32.xlu2 %v1529_v18, %s2153_s9 }
 0x49c   : > { %1443 = vrot.lane.b32.xlu0 %v1438_v41, %s2151_s1 }
 0x4ae   : > { %s1874_s17 = spop %1873 }
 0x4af   : > { %v1573_v45 = vstv %s1874_s17 }
 0x4b0   : > { %1993 = vrcp.f32 %v1573_v45  ;;  %v1585_v29 = vand.u32 2147483648, %v1573_v45  ;;  %vm1579_vm9 = vweird.f32 %v1573_v45  ;;  %v1583_v35 = vand.u32 2147483647, %v1573_v45 }
 0x4b2   : > { %v1586_v49 = vor.u32 1.1754944e-38, %v1585_v29  ;;  %vm1584_vm0 = vcmp.eq.f32.partialorder %v1583_v35, 8.507059e+37 }
 0x4b6   : > { %v1994_v32 = vpop.eup %1993 }
 0x4b7   : > { %v1575_v42 = vmul.f32 %v1994_v32, %v1573_v45  ;;  %vm1580_vm12 = vweird.f32 %v1994_v32 }
 0x4b8   : > { %vm1581_vm14 = vmor %vm1579_vm9, %vm1580_vm12  ;;  %vm1104_vm9 = vcmp.lt.s32.totalorder %v1102_v30, 16 }
 0x4b9   : > { %v1576_v40 = vsub.f32 1.0, %v1575_v42  ;;  %vm3238_vm12 = vmand %vm1195_vm2, %vm1196_vm3  ;;  %vm1450_vm2 = vcmp.lt.s32.totalorder %v1448_v16, 16 }
 0x4bb   : > { %v1577_v27 = vmul.f32 %v1994_v32, %v1576_v40 }
 0x4bd   : > { %v1578_v0 = vadd.f32 %v1994_v32, %v1577_v27 }
 0x4bf   : > { %v1582_v23 = vsel %vm1581_vm14, %v1994_v32, %v1578_v0  ;;  %vm3245_vm14 = vmand %vm1011_vm13, %vm1012_vm15  ;;  %vm1541_vm13 = vcmp.ge.s32.totalorder %v1540_v24, 0 }
 0x4c0   : > { %v1587_v13 = vsel %vm1584_vm0, %v1586_v49, %v1582_v23  ;;  %vm1537_vm0 = vcmp.lt.s32.totalorder %v2374_v38, 80  ;;  %vm3263_vm15 = vmand %vm1103_vm8, %vm1104_vm9  ;;  %v1556_v49 = vstv %s1864_s16 }
 0x4c1   : > { %1875 = vpush %v1587_v13 }
 0x4dd   : > { %v1006_v43 = vpop.permute.xlu2 %1005 }
 0x4e5   : > { %v1096_v63 = vpop.permute.xlu2 %1095 }
 0x4ed   : > { %v1352_v26 = vpop.permute.xlu2 %1351 }
 0x4f2   : > { %s1876_s15 = spop %1875 }
 0x4f3   : > { %s1589_s22 = smul.f32 %s1876_s15, %s3270_s24 }
 0x4f5   : > { %v1188_v56 = vpop.permute.xlu1 %1187  ;;  %v1534_v48 = vpop.permute.xlu2 %1533  ;;  %v1590_v13 = vstv %s1589_s22 }
 0x4f6   : > { %v1004_v57 = vpop.permute.xlu0 %1003 }
 0x4f7   : > { %v1008_v28 = vsel %vm1007_vm6, %v1004_v57, %v1006_v43  ;;  %v1009_v15 = vsel %vm1007_vm6, %v1006_v43, %v1004_v57  ;;  %vm1542_vm6 = vcmp.lt.s32.totalorder %v1540_v24, 16  ;;  %v1592_v43 = vstv %s1863_s7 }
 0x4f8   : > { %v1016_v33 = vrot.slane %v1008_v28, 7  ;;  %vm1543_vm3 = vmand %vm1541_vm13, %vm1542_vm6 }
 0x4fa   : > { %v1017_v55 = vsel %vm768_vm5, %v1009_v15, %v1016_v33 }
 0x4fb   : > { %v1019_v5 = vsel %vm3245_vm14, %v1017_v55, 0.0 }
 0x4fd   : > { %v1098_v52 = vpop.permute.xlu1 %1097 }
 0x4fe   : > { %v1190_v34 = vpop.permute.xlu0 %1189  ;;  %v1100_v62 = vsel %vm1099_vm7, %v1096_v63, %v1098_v52  ;;  %v1101_v53 = vsel %vm1099_vm7, %v1098_v52, %v1096_v63  ;;  %vm1445_vm7 = vcmp.lt.s32.totalorder %v2374_v38, 96 }
 0x4ff   : > { %v1192_v21 = vsel %vm1191_vm4, %v1188_v56, %v1190_v34  ;;  %v1108_v54 = vrot.slane %v1100_v62, 7  ;;  %v1193_v50 = vsel %vm1191_vm4, %v1190_v34, %v1188_v56  ;;  %vm3258_vm4 = vmand %vm1357_vm10, %vm1358_vm1 }
 0x500   : > { %v1200_v3 = vrot.slane %v1192_v21, 7 }
 0x501   : > { %v1109_v36 = vsel %vm768_vm5, %v1101_v53, %v1108_v54  ;;  %v3458_v54 = vld [vmem:[#allocation26_spill] sm:$0xff]  ;;  %v3466_v53 = vld [vmem:[#allocation27_spill] sm:$0xff] }
 0x502   : > { %v1201_v7 = vsel %vm768_vm5, %v1193_v50, %v1200_v3  ;;  %v1111_v22 = vsel %vm3263_vm15, %v1109_v36, 0.0 }
 0x503   : > { %v1203_v37 = vsel %vm3238_vm12, %v1201_v7, 0.0  ;;  %v1274_v32 = vadd.f32 %v3209_v25, %v1111_v22  ;;  %v3461_v7 = vld [vmem:[#allocation25_spill] sm:$0xff] }
 0x504   : > { %v1204_v14 = vadd.f32 %v1203_v37, %v1019_v5 }
 0x505   : > { %v1442_v58 = vpop.permute.xlu1 %1441 }
 0x506   : > { %v1350_v10 = vpop.permute.xlu0 %1349 }
 0x507   : > { %v1355_v51 = vsel %vm1353_vm11, %v1352_v26, %v1350_v10  ;;  %v1354_v31 = vsel %vm1353_vm11, %v1350_v10, %v1352_v26  ;;  %vm1449_vm11 = vcmp.ge.s32.totalorder %v1448_v16, 0  ;;  %v3456_v10 = vld [vmem:[#allocation28_spill] sm:$0xff] }
 0x508   : > { %v1362_v39 = vrot.slane %v1355_v51, 7  ;;  %vm1451_vm10 = vmand %vm1449_vm11, %vm1450_vm2  ;;  %v3457_v51 = vld [vmem:[#allocation31_spill] sm:$0xff] }
 0x50a   : > { %v1363_v12 = vsel %vm768_vm5, %v1354_v31, %v1362_v39  ;;  %v3459_v39 = vld [vmem:[#allocation30_spill] sm:$0xff]  ;;  %v3464_v31 = vld [vmem:[#allocation24_spill] sm:$0xff] }
 0x50b   : > { %v1365_v17 = vsel %vm3258_vm4, %v1363_v12, 0.0 }
 0x50c   : > { %v1366_v18 = vadd.f32 %v1365_v17, %v1204_v14 }
 0x50d   : > { %v1536_v61 = vpop.permute.xlu1 %1535 }
 0x50e   : > { %v1539_v60 = vsel %vm1537_vm0, %v1536_v61, %v1534_v48  ;;  %v1444_v44 = vpop.permute.xlu0 %1443  ;;  %v1538_v9 = vsel %vm1537_vm0, %v1534_v48, %v1536_v61 }
 0x50f   : > { %v1546_v47 = vrot.slane %v1539_v60, 7  ;;  %v1447_v6 = vsel %vm1445_vm7, %v1444_v44, %v1442_v58  ;;  %v1446_v45 = vsel %vm1445_vm7, %v1442_v58, %v1444_v44 }
 0x510   : > { %v1454_v19 = vrot.slane %v1447_v6, 7 }
 0x511   : > { %v1547_v41 = vsel %vm768_vm5, %v1538_v9, %v1546_v47 }
 0x512   : > { %v1549_v42 = vsel %vm1543_vm3, %v1547_v41, 0.0  ;;  %v1455_v29 = vsel %vm768_vm5, %v1446_v45, %v1454_v19 }
 0x513   : > { %v1550_v40 = vadd.f32 %v1549_v42, %v1366_v18  ;;  %v1457_v35 = vsel %vm1451_vm10, %v1455_v29, 0.0 }
 0x514   : > { %v1458_v27 = vadd.f32 %v1457_v35, %v1274_v32 }
 0x516   : > { %v1551_v0 = vadd.f32 %v1550_v40, %v1458_v27 }
 0x518   : > { %v1557_v23 = vsub.f32 %v1551_v0, %v1556_v49 }
 0x51a   : > { %v1591_v56 = vmul.f32 %v1590_v13, %v1557_v23 }
 0x51c   : > { %v1593_v57 = vadd.f32 %v1592_v43, %v1591_v56 }
 0x51e   : > { %v1594_v63 = vsub.f32 0.0, %v1593_v57 }
 0x520   : > { %v1595_v38 = vmul.f32 1.442695, %v1594_v63 }
 0x522   : > { %1995 = vpow2.f32 %v1595_v38 }
 0x528   : > { %v1996_v52 = vpop.eup %1995 }
 0x529   : > { %v1597_v25 = vadd.f32 1.0, %v1996_v52 }
 0x52b   : > { %1997 = vrcp.f32 %v1597_v25  ;;  %v1609_v8 = vand.u32 2147483648, %v1597_v25  ;;  %v1607_v26 = vand.u32 2147483647, %v1597_v25  ;;  %vm1603_vm1 = vweird.f32 %v1597_v25 }
 0x52d   : > { %v1610_v28 = vor.u32 1.1754944e-38, %v1609_v8  ;;  %vm1608_vm9 = vcmp.eq.f32.partialorder %v1607_v26, 8.507059e+37 }
 0x531   : > { %v1998_v34 = vpop.eup %1997 }
 0x532   : > { %v1599_v4 = vmul.f32 %v1998_v34, %v1597_v25  ;;  %vm1604_vm5 = vweird.f32 %v1998_v34 }
 0x533   : > { %vm1605_vm8 = vmor %vm1603_vm1, %vm1604_vm5 }
 0x534   : > { %v1600_v2 = vsub.f32 1.0, %v1599_v4 }
 0x536   : > { %v1601_v21 = vmul.f32 %v1998_v34, %v1600_v2 }
 0x538   : > { %v1602_v11 = vadd.f32 %v1998_v34, %v1601_v21 }
 0x53a   : > { %v1606_v30 = vsel %vm1605_vm8, %v1998_v34, %v1602_v11 }
 0x53b   : > { %v1611_v62 = vsel %vm1608_vm9, %v1610_v28, %v1606_v30 }
 0x53c   : > { %v1614_v3 = vperm.slane %v1611_v62, 0  ;;  %v1615_v58 = vperm.slane %v1611_v62, 1 }
 0x53e   : > { %v1618_v33 = vmul.f32 %v1614_v3, %v3456_v10  ;;  %v1619_v24 = vmul.f32 %v1615_v58, %v3457_v51  ;;  %v1620_v50 = vmul.f32 %v1614_v3, %v3458_v54  ;;  %v1621_v59 = vmul.f32 %v1615_v58, %v3459_v39 }
 0x53f   : > { %v1622_v16 = vmul.f32 %v1614_v3, %v3461_v7  ;;  %v1623_v15 = vmul.f32 %v1615_v58, %v3463_v1  ;;  %v1624_v55 = vmul.f32 %v1614_v3, %v3464_v31  ;;  %v1625_v20 = vmul.f32 %v1615_v58, %v3466_v53 }
 0x540   : > { %1626 = vst [vmem:[%s379_s23] sm:$0xff] %v1618_v33 }
 0x541   : > { %1627 = vst [vmem:[%s379_s23 + $0x8] sm:$0xff] %v1619_v24 }
 0x542   : > { %1628 = vst [vmem:[%s379_s23 + $0x10] sm:$0xff] %v1620_v50 }
 0x543   : > { %1629 = vst [vmem:[%s379_s23 + $0x18] sm:$0xff] %v1621_v59 }
 0x544   : > { %1630 = vst [vmem:[%s379_s23 + $0x20] sm:$0xff] %v1622_v16 }
 0x545   : > { %1631 = vst [vmem:[%s379_s23 + $0x28] sm:$0xff] %v1623_v15 }
 0x546   : > { %1632 = vst [vmem:[%s379_s23 + $0x30] sm:$0xff] %v1624_v55 }
 0x547   : > { %1633 = vst [vmem:[%s379_s23 + $0x38] sm:$0xff] %v1625_v20 }
 0x548   : > { %2086 = shalt.err (!%p2083_p8)
}
 0x549   : > { %s2154_s9 = smov 256  }
 0x54a   : > { %1887 = dma.vmem_to_hbm [thread:$0]  (%p2257_p11), %s1648_s25, 1024, %s1650_s6, %s1635_s12, %s2154_s9, %s2154_s9, %s2148_s19  }
 0x54b PF: > { %s3467_s17 = sld [smem:[#allocation14_spill]] }
 0x54c   : > { %s3469_s29 = sld [smem:[#allocation17_spill]] }
 0x551   : > { %s1664_s18 = sand.u32 1, %s3467_s17  }
 0x552   : > { %p3470_p9 = scmp.ge.s32.totalorder %s3469_s29, 2  ;;  %s1665_s24 = scalar_lea.sflag [#allocation4], %s1664_s18 }
 0x554   : > { %p1901_p10 = pnand %p3470_p9, %p2261_p12 }
 0x556   : > { %p1902_p1 = pneg %p1901_p10 }
 0x558   : > { %2116 = dma.done.wait (%p1902_p1), %s1665_s24, 1024  }
 0x559   : > { %2118 = vsyncadd (%p1902_p1), %s1665_s24, 4294966272  ;;  %s3471_s12 = sld [smem:[#allocation19_spill]] }
 0x55a   : > { %s3472_s30 = sld [smem:[#allocation15_spill]] }
 0x55b   : > { %s3473_s10 = sld [smem:[#allocation16_spill]] }
 0x55c   : > { %s3474_s11 = sld [smem:[#allocation20_spill]] }
 0x55f   : > { %p24_p2 = scmp.ge.s32.totalorder %s3471_s12, 4  }
 0x561   :  { %26 = sbr.rel (!%p24_p2) target bundleno = 18 (0x12), region = 110 }
 0x566   :  { %1671 = vsyncpa [#allocation3], 1 }
 0x567   :  { %1673 = vsyncpa [#allocation3 + $0x1], 1 }
 0x568   :  { %1674 = vsyncpa [#allocation4], 1 }
 0x569   :  { %1676 = vsyncpa [#allocation4 + $0x1], 1 }
 0x56a   :  { %1677 = vsyncpa [#allocation5], 1 }
 0x56b   :  { %1679 = vsyncpa [#allocation5 + $0x1], 1 }
 0x56c   :  { %1680 = vsyncpa [#allocation8], 1 }

</bundles_post_ra>
